<compile_context>
chip_gen: v6e
topology: v6e:2x2x1
jax: 0.10.0
libtpu: 0.0.40
codegen_flags: <defaults>
</compile_context>

<pallas_src>
import functools
import math

import jax
import jax.numpy as jnp
from jax.experimental import pallas as pl
from jax.experimental.pallas import tpu as pltpu

NEG_INF = -1e9

CFG = dict(
    vocab=64,
    d_model=32,
    d_kv=8,
    num_heads=4,
    d_ff=64,
    num_layers=2,
    rel_buckets=8,
    rel_max_dist=16,
    eps=1e-6,
)


# ----------------------------------------------------------------------------
# In-kernel helpers (value-level, traced inside the Pallas kernels)
# ----------------------------------------------------------------------------
def _dot(a, b):
    """a @ b with f32 accumulation (MXU)."""
    return jax.lax.dot_general(a, b, (((1,), (0,)), ((), ())),
                               preferred_element_type=jnp.float32)


def _dot_t(a, b):
    """a @ b.T (contract last dims) with f32 accumulation."""
    return jax.lax.dot_general(a, b, (((1,), (1,)), ((), ())),
                               preferred_element_type=jnp.float32)


def _bf16(x):
    return x.astype(jnp.bfloat16)


def _rms(x, w, eps):
    """T5LayerNorm: x * rsqrt(mean(x^2) + eps) * w  (no mean, no bias)."""
    var = jnp.mean(x * x, axis=-1, keepdims=True)
    return x * jax.lax.rsqrt(var + eps) * w


def _gelu_new(x):
    """gelu_new (tanh approximation), as used by flan-t5 gated-gelu."""
    c = math.sqrt(2.0 / math.pi)
    return 0.5 * x * (1.0 + jnp.tanh(c * (x + 0.044715 * x * x * x)))


def _softmax_rows(s):
    """Row softmax; masked entries carry -1e9 additive bias -> exp underflows."""
    s = s - jnp.max(s, axis=-1, keepdims=True)
    p = jnp.exp(s)
    return p * pl.reciprocal(jnp.sum(p, axis=-1, keepdims=True), approx=True)


# ----------------------------------------------------------------------------
# Encoder kernel: grid = (batch, layer).  Per-layer weights streamed, residual
# activation carried in f32 VMEM scratch, final RMSNorm fused at l == last.
# ----------------------------------------------------------------------------
def _encoder_kernel(x_ref, bias_ref,
                    ln1_ref, wqkv_ref, wo_ref, ln2_ref, wi_ref, wof_ref,
                    lnf_ref, o_ref,
                    x_acc, ctx_acc,
                    *, num_heads, d_kv, d_ff, eps):
    inner = num_heads * d_kv
    l = pl.program_id(1)

    @pl.when(l == 0)
    def _():
        x_acc[...] = x_ref[0]                          # (Le, D) f32 residual

    x = x_acc[...]

    # ---- self-attention sublayer (RMSNorm fused in) ----
    normed = _bf16(_rms(x, ln1_ref[0], eps))
    qkv = _dot(normed, wqkv_ref[0])                    # (Le, 3*inner), one wide dot
    q = qkv[:, :inner]
    k = qkv[:, inner:2 * inner]
    v = qkv[:, 2 * inner:]
    for h in range(num_heads):
        c0, c1 = h * d_kv, (h + 1) * d_kv
        s = _dot_t(_bf16(q[:, c0:c1]), _bf16(k[:, c0:c1])) + bias_ref[0, h]
        p = _softmax_rows(s)
        ctx_acc[:, c0:c1] = _dot(_bf16(p), _bf16(v[:, c0:c1]))
    # single output projection for all heads (no per-head residual chain)
    x = x + _dot(_bf16(ctx_acc[...]), wo_ref[0])

    # ---- gated-GELU FFN sublayer (RMSNorm fused in) ----
    normed = _bf16(_rms(x, ln2_ref[0], eps))
    hh = _dot(normed, wi_ref[0])                       # (Le, 2*d_ff), fused wi0|wi1
    act = _gelu_new(hh[:, :d_ff]) * hh[:, d_ff:]
    x = x + _dot(_bf16(act), wof_ref[0])

    x_acc[...] = x

    @pl.when(l == pl.num_programs(1) - 1)
    def _():
        o_ref[0] = _rms(x, lnf_ref[...], eps)


# ----------------------------------------------------------------------------
# Decoder kernel: grid = (batch, layer).  Self-attn (skipped math when Ld==1),
# cross-attn over final encoder states, FFN, final RMSNorm + lm_head fused.
# ----------------------------------------------------------------------------
def _decoder_kernel(y_ref, enc_ref, sbias_ref, cbias_ref,
                    ln1_ref, wqkv_ref, wo1_ref,
                    ln2_ref, wq_ref, wkv_ref, wo2_ref,
                    ln3_ref, wi_ref, wof_ref,
                    lnf_ref, lm_ref, o_ref,
                    y_acc, ctx_acc,
                    *, num_heads, d_kv, d_ff, eps, single_step):
    inner = num_heads * d_kv
    l = pl.program_id(1)

    @pl.when(l == 0)
    def _():
        y_acc[...] = y_ref[0]                          # (Ld, D) f32 residual

    y = y_acc[...]
    enc = _bf16(enc_ref[0])                            # (Le, D)

    # ---- masked self-attention ----
    normed = _bf16(_rms(y, ln1_ref[0], eps))
    if single_step:
        # Ld == 1: softmax over exactly one valid (causal) key -> p == 1,
        # so ctx == v.  Skip QK^T / softmax / PV entirely.
        attn = _dot(normed, wqkv_ref[0][:, 2 * inner:])          # V projection only
    else:
        qkv = _dot(normed, wqkv_ref[0])
        q = qkv[:, :inner]
        k = qkv[:, inner:2 * inner]
        v = qkv[:, 2 * inner:]
        for h in range(num_heads):
            c0, c1 = h * d_kv, (h + 1) * d_kv
            s = _dot_t(_bf16(q[:, c0:c1]), _bf16(k[:, c0:c1])) + sbias_ref[h]
            p = _softmax_rows(s)
            ctx_acc[:, c0:c1] = _dot(_bf16(p), _bf16(v[:, c0:c1]))
        attn = ctx_acc[...]
    y = y + _dot(_bf16(attn), wo1_ref[0])

    # ---- cross-attention over (already final-normed) encoder output ----
    normed = _bf16(_rms(y, ln2_ref[0], eps))
    qc = _dot(normed, wq_ref[0])                       # (Ld, inner)
    kvc = _dot(enc, wkv_ref[0])                        # (Le, 2*inner), fused K|V
    kc = kvc[:, :inner]
    vc = kvc[:, inner:]
    cbias = cbias_ref[0]                               # (1, Le): encoder padding mask
    for h in range(num_heads):
        c0, c1 = h * d_kv, (h + 1) * d_kv
        s = _dot_t(_bf16(qc[:, c0:c1]), _bf16(kc[:, c0:c1])) + cbias
        p = _softmax_rows(s)
        ctx_acc[:, c0:c1] = _dot(_bf16(p), _bf16(vc[:, c0:c1]))
    y = y + _dot(_bf16(ctx_acc[...]), wo2_ref[0])

    # ---- gated-GELU FFN ----
    normed = _bf16(_rms(y, ln3_ref[0], eps))
    hh = _dot(normed, wi_ref[0])
    act = _gelu_new(hh[:, :d_ff]) * hh[:, d_ff:]
    y = y + _dot(_bf16(act), wof_ref[0])

    y_acc[...] = y

    @pl.when(l == pl.num_programs(1) - 1)
    def _():
        dec = _rms(y, lnf_ref[...], eps)
        # lm_head fused in; lane-dense output slab (vocab padded to 128).
        o_ref[0] = _dot(_bf16(dec), lm_ref[...])


# ----------------------------------------------------------------------------
# BlockSpec helpers
# ----------------------------------------------------------------------------
def _per_batch_spec(arr):
    rest = arr.shape[1:]
    nz = len(rest)
    return pl.BlockSpec((1,) + rest, lambda b, l, _nz=nz: (b,) + (0,) * _nz)


def _per_layer_spec(arr):
    rest = arr.shape[1:]
    nz = len(rest)
    return pl.BlockSpec((1,) + rest, lambda b, l, _nz=nz: (l,) + (0,) * _nz)


def _shared_spec(arr):
    nd = arr.ndim
    return pl.BlockSpec(arr.shape, lambda b, l, _nd=nd: (0,) * _nd)


_COMPILER_PARAMS = pltpu.CompilerParams(
    dimension_semantics=("parallel", "arbitrary"),   # batch parallel, layer reduction
    vmem_limit_bytes=32 * 1024 * 1024,
)


# ----------------------------------------------------------------------------
# pallas_call wrappers
# ----------------------------------------------------------------------------
def encoder_stack(x_emb, enc_bias, pk, cfg):
    B, Le, D = x_emb.shape
    NL = cfg["num_layers"]
    inner = cfg["num_heads"] * cfg["d_kv"]
    kernel = functools.partial(
        _encoder_kernel, num_heads=cfg["num_heads"], d_kv=cfg["d_kv"],
        d_ff=cfg["d_ff"], eps=cfg["eps"])
    in_specs = [
        _per_batch_spec(x_emb),
        _per_batch_spec(enc_bias),
        _per_layer_spec(pk["ln1"]),
        _per_layer_spec(pk["wqkv"]),
        _per_layer_spec(pk["wo"]),
        _per_layer_spec(pk["ln2"]),
        _per_layer_spec(pk["wi"]),
        _per_layer_spec(pk["wof"]),
        _shared_spec(pk["lnf"]),
    ]
    return pl.pallas_call(
        kernel,
        out_shape=jax.ShapeDtypeStruct((B, Le, D), jnp.float32),
        grid=(B, NL),
        in_specs=in_specs,
        out_specs=pl.BlockSpec((1, Le, D), lambda b, l: (b, 0, 0)),
        scratch_shapes=[pltpu.VMEM((Le, D), jnp.float32),        # residual carry
                        pltpu.VMEM((Le, inner), jnp.float32)],   # per-head ctx slab
        compiler_params=_COMPILER_PARAMS,
    )(x_emb, enc_bias, pk["ln1"], pk["wqkv"], pk["wo"],
      pk["ln2"], pk["wi"], pk["wof"], pk["lnf"])


def decoder_stack(y_emb, enc_out, self_bias, cross_bias, pk, cfg):
    B, Ld, D = y_emb.shape
    NL = cfg["num_layers"]
    inner = cfg["num_heads"] * cfg["d_kv"]
    Vp = pk["lm_head"].shape[1]
    kernel = functools.partial(
        _decoder_kernel, num_heads=cfg["num_heads"], d_kv=cfg["d_kv"],
        d_ff=cfg["d_ff"], eps=cfg["eps"], single_step=(Ld == 1))
    in_specs = [
        _per_batch_spec(y_emb),
        _per_batch_spec(enc_out),
        _shared_spec(self_bias),
        _per_batch_spec(cross_bias),
        _per_layer_spec(pk["ln1"]),
        _per_layer_spec(pk["wqkv"]),
        _per_layer_spec(pk["wo1"]),
        _per_layer_spec(pk["ln2"]),
        _per_layer_spec(pk["wq"]),
        _per_layer_spec(pk["wkv"]),
        _per_layer_spec(pk["wo2"]),
        _per_layer_spec(pk["ln3"]),
        _per_layer_spec(pk["wi"]),
        _per_layer_spec(pk["wof"]),
        _shared_spec(pk["lnf"]),
        _shared_spec(pk["lm_head"]),
    ]
    return pl.pallas_call(
        kernel,
        out_shape=jax.ShapeDtypeStruct((B, Ld, Vp), jnp.float32),
        grid=(B, NL),
        in_specs=in_specs,
        out_specs=pl.BlockSpec((1, Ld, Vp), lambda b, l: (b, 0, 0)),
        scratch_shapes=[pltpu.VMEM((Ld, D), jnp.float32),
                        pltpu.VMEM((Ld, inner), jnp.float32)],
        compiler_params=_COMPILER_PARAMS,
    )(y_emb, enc_out, self_bias, cross_bias,
      pk["ln1"], pk["wqkv"], pk["wo1"], pk["ln2"], pk["wq"], pk["wkv"],
      pk["wo2"], pk["ln3"], pk["wi"], pk["wof"], pk["lnf"], pk["lm_head"])


# ----------------------------------------------------------------------------
# Plain-JAX glue: relative position bias / masks (tiny, computed once)
# ----------------------------------------------------------------------------
def relative_position_bucket(relative_position, bidirectional, num_buckets, max_distance):
    relative_buckets = jnp.zeros_like(relative_position)
    if bidirectional:
        num_buckets //= 2
        relative_buckets = relative_buckets + (relative_position > 0).astype(jnp.int32) * num_buckets
        relative_position = jnp.abs(relative_position)
    else:
        relative_position = -jnp.minimum(relative_position, 0)
    max_exact = num_buckets // 2
    is_small = relative_position < max_exact
    safe_rel = jnp.maximum(relative_position, 1)
    rel_if_large = max_exact + (
        jnp.log(safe_rel.astype(jnp.float32) / max_exact)
        / math.log(max_distance / max_exact)
        * (num_buckets - max_exact)
    ).astype(jnp.int32)
    rel_if_large = jnp.minimum(rel_if_large, num_buckets - 1)
    return relative_buckets + jnp.where(is_small, relative_position, rel_if_large)


def compute_position_bias(rel_emb, q_len, k_len, bidirectional, num_buckets, max_distance):
    context_position = jnp.arange(q_len)[:, None]
    memory_position = jnp.arange(k_len)[None, :]
    relative_position = memory_position - context_position      # key - query
    buckets = relative_position_bucket(relative_position, bidirectional,
                                       num_buckets, max_distance)
    values = rel_emb[buckets]                                    # (q, k, H)
    return jnp.transpose(values, (2, 0, 1))                      # (H, q, k)


# ----------------------------------------------------------------------------
# Full forward (2 pallas_calls total: encoder stack, decoder stack + lm_head)
# ----------------------------------------------------------------------------
def t5_forward(packed, input_ids, attention_mask, decoder_input_ids, cfg):
    B, Le = input_ids.shape
    Ld = decoder_input_ids.shape[1]
    V = cfg["vocab"]

    mask_add = (1.0 - attention_mask.astype(jnp.float32)) * NEG_INF      # (B, Le)

    # -------------------- encoder --------------------
    x_emb = packed["shared"][input_ids]                                  # (B, Le, D)
    enc_rel = compute_position_bias(packed["enc_rel_bias"], Le, Le, True,
                                    cfg["rel_buckets"], cfg["rel_max_dist"])
    enc_bias = enc_rel[None, :, :, :] + mask_add[:, None, None, :]       # (B,H,Le,Le)
    enc_out = encoder_stack(x_emb, enc_bias, packed["enc"], cfg)         # (B, Le, D)

    # -------------------- decoder + lm head --------------------
    y_emb = packed["shared"][decoder_input_ids]                          # (B, Ld, D)
    dec_rel = compute_position_bias(packed["dec_rel_bias"], Ld, Ld, False,
                                    cfg["rel_buckets"], cfg["rel_max_dist"])
    causal_add = (1.0 - jnp.tril(jnp.ones((Ld, Ld), jnp.float32))) * NEG_INF
    self_bias = dec_rel + causal_add[None]                               # (H, Ld, Ld)
    cross_bias = mask_add[:, None, :]                                    # (B, 1, Le)
    logits_pad = decoder_stack(y_emb, enc_out, self_bias, cross_bias,
                               packed["dec"], cfg)                       # (B, Ld, Vpad)
    # flan-t5 / t5-v1.1: untied lm_head, no d_model**-0.5 scaling.
    return logits_pad[:, :, :V]


# ----------------------------------------------------------------------------
# Deterministic parameter init (synthetic weights, T5-shaped) + packing
# ----------------------------------------------------------------------------
def init_params(key, cfg):
    D, dk, H = cfg["d_model"], cfg["d_kv"], cfg["num_heads"]
    F, V = cfg["d_ff"], cfg["vocab"]
    inner = H * dk
    keys = iter(jax.random.split(key, 256))

    def nrm(shape, scale=0.05):
        return jax.random.normal(next(keys), shape, jnp.float32) * scale

    def attn_params():
        return {"q": nrm((D, inner)), "k": nrm((D, inner)),
                "v": nrm((D, inner)), "o": nrm((inner, D))}

    def ffn_params():
        return {"wi0": nrm((D, F)), "wi1": nrm((D, F)), "wo": nrm((F, D))}

    def enc_layer():
        return {"attn": attn_params(), "ffn": ffn_params(),
                "ln1": jnp.ones((D,), jnp.float32),
                "ln2": jnp.ones((D,), jnp.float32)}

    def dec_layer():
        return {"self_attn": attn_params(), "cross_attn": attn_params(),
                "ffn": ffn_params(),
                "ln1": jnp.ones((D,), jnp.float32),
                "ln2": jnp.ones((D,), jnp.float32),
                "ln3": jnp.ones((D,), jnp.float32)}

    return {
        "shared": nrm((V, D), 1.0),
        "lm_head": nrm((D, V)),
        "enc_rel_bias": nrm((cfg["rel_buckets"], H)),
        "dec_rel_bias": nrm((cfg["rel_buckets"], H)),
        "enc_layers": [enc_layer() for _ in range(cfg["num_layers"])],
        "dec_layers": [dec_layer() for _ in range(cfg["num_layers"])],
        "enc_final_ln": jnp.ones((D,), jnp.float32),
        "dec_final_ln": jnp.ones((D,), jnp.float32),
    }


def pack_params(params, cfg):
    """Stack per-layer weights on a leading layer axis (streamed by the layer
    grid axis), fuse QKV / KV / gated-FFN weights, cast matmul weights to
    bf16, pad lm_head to a lane-dense 128."""
    D = cfg["d_model"]
    V = cfg["vocab"]
    Vp = ((V + 127) // 128) * 128
    wdt = jnp.bfloat16

    def ln_stack(ws):
        return jnp.stack([w.reshape(1, D) for w in ws])          # (NL, 1, D) f32

    def stack_w(ws):
        return jnp.stack(ws).astype(wdt)                         # (NL, ...) bf16

    enc = params["enc_layers"]
    dec = params["dec_layers"]

    packed_enc = dict(
        ln1=ln_stack([l["ln1"] for l in enc]),
        wqkv=stack_w([jnp.concatenate([l["attn"]["q"], l["attn"]["k"],
                                       l["attn"]["v"]], axis=1) for l in enc]),
        wo=stack_w([l["attn"]["o"] for l in enc]),
        ln2=ln_stack([l["ln2"] for l in enc]),
        wi=stack_w([jnp.concatenate([l["ffn"]["wi0"], l["ffn"]["wi1"]], axis=1)
                    for l in enc]),
        wof=stack_w([l["ffn"]["wo"] for l in enc]),
        lnf=params["enc_final_ln"].reshape(1, D),
    )
    packed_dec = dict(
        ln1=ln_stack([l["ln1"] for l in dec]),
        wqkv=stack_w([jnp.concatenate([l["self_attn"]["q"], l["self_attn"]["k"],
                                       l["self_attn"]["v"]], axis=1) for l in dec]),
        wo1=stack_w([l["self_attn"]["o"] for l in dec]),
        ln2=ln_stack([l["ln2"] for l in dec]),
        wq=stack_w([l["cross_attn"]["q"] for l in dec]),
        wkv=stack_w([jnp.concatenate([l["cross_attn"]["k"], l["cross_attn"]["v"]],
                                     axis=1) for l in dec]),
        wo2=stack_w([l["cross_attn"]["o"] for l in dec]),
        ln3=ln_stack([l["ln3"] for l in dec]),
        wi=stack_w([jnp.concatenate([l["ffn"]["wi0"], l["ffn"]["wi1"]], axis=1)
                    for l in dec]),
        wof=stack_w([l["ffn"]["wo"] for l in dec]),
        lnf=params["dec_final_ln"].reshape(1, D),
        lm_head=jnp.pad(params["lm_head"], ((0, 0), (0, Vp - V))).astype(wdt),
    )
    return dict(
        shared=params["shared"],
        enc_rel_bias=params["enc_rel_bias"],
        dec_rel_bias=params["dec_rel_bias"],
        enc=packed_enc,
        dec=packed_dec,
    )


# ----------------------------------------------------------------------------
# Pure-JAX f32 reference (HF T5 semantics) for a tolerance check
# ----------------------------------------------------------------------------
def reference_forward(params, input_ids, attention_mask, decoder_input_ids, cfg):
    D, H, dk = cfg["d_model"], cfg["num_heads"], cfg["d_kv"]
    eps = cfg["eps"]
    inner = H * dk

    def rms(x, w):
        return x * jax.lax.rsqrt(jnp.mean(x * x, -1, keepdims=True) + eps) * w

    def mha(xq, xkv, p, bias):
        B, Lq, _ = xq.shape
        Lk = xkv.shape[1]
        q = (xq @ p["q"]).reshape(B, Lq, H, dk)
        k = (xkv @ p["k"]).reshape(B, Lk, H, dk)
        v = (xkv @ p["v"]).reshape(B, Lk, H, dk)
        s = jnp.einsum("bqhd,bkhd->bhqk", q, k) + bias
        a = jax.nn.softmax(s, axis=-1)
        ctx = jnp.einsum("bhqk,bkhd->bqhd", a, v).reshape(B, Lq, inner)
        return ctx @ p["o"]

    def ffn(x, p):
        return (_gelu_new(x @ p["wi0"]) * (x @ p["wi1"])) @ p["wo"]

    B, Le = input_ids.shape
    Ld = decoder_input_ids.shape[1]
    mask_add = (1.0 - attention_mask.astype(jnp.float32)) * NEG_INF

    x = params["shared"][input_ids]
    enc_rel = compute_position_bias(params["enc_rel_bias"], Le, Le, True,
                                    cfg["rel_buckets"], cfg["rel_max_dist"])
    enc_bias = enc_rel[None] + mask_add[:, None, None, :]
    for lyr in params["enc_layers"]:
        n = rms(x, lyr["ln1"])
        x = x + mha(n, n, lyr["attn"], enc_bias)
        x = x + ffn(rms(x, lyr["ln2"]), lyr["ffn"])
    enc_out = rms(x, params["enc_final_ln"])

    y = params["shared"][decoder_input_ids]
    dec_rel = compute_position_bias(params["dec_rel_bias"], Ld, Ld, False,
                                    cfg["rel_buckets"], cfg["rel_max_dist"])
    causal = (1.0 - jnp.tril(jnp.ones((Ld, Ld), jnp.float32))) * NEG_INF
    self_bias = (dec_rel + causal[None])[None]
    cross_bias = mask_add[:, None, None, :]
    for lyr in params["dec_layers"]:
        n = rms(y, lyr["ln1"])
        y = y + mha(n, n, lyr["self_attn"], self_bias)
        y = y + mha(rms(y, lyr["ln2"]), enc_out, lyr["cross_attn"], cross_bias)
        y = y + ffn(rms(y, lyr["ln3"]), lyr["ffn"])
    dec_out = rms(y, params["dec_final_ln"])
    return dec_out @ params["lm_head"]


# ----------------------------------------------------------------------------
if __name__ == "__main__":
    key = jax.random.PRNGKey(0)
    k_params, k_ids = jax.random.split(key)

    params = init_params(k_params, CFG)
    packed = pack_params(params, CFG)          # one-time host-side packing

    B, Le, Ld = 2, 8, 1
    input_ids = jax.random.randint(k_ids, (B, Le), 0, CFG["vocab"], dtype=jnp.int32)
    # Exercise the attention mask: second sequence has 2 padding positions.
    attention_mask = jnp.array([[1] * Le, [1] * (Le - 2) + [0] * 2], dtype=jnp.int32)
    # decoder_input_ids = ones((B,1)) * decoder_start_token_id (= pad token 0 for T5)
    decoder_input_ids = jnp.zeros((B, Ld), dtype=jnp.int32)

    forward = jax.jit(lambda p, a, m, d: t5_forward(p, a, m, d, CFG))
    logits = forward(packed, input_ids, attention_mask, decoder_input_ids)
    jax.block_until_ready(logits)

    assert logits.shape == (B, Ld, CFG["vocab"])
    assert bool(jnp.all(jnp.isfinite(logits)))

    # Pure-JAX f32 reference; bf16 weights + approx reciprocal give small drift.
    ref = reference_forward(params, input_ids, attention_mask,
                            decoder_input_ids, CFG)
    max_err = float(jnp.max(jnp.abs(logits - ref)))
    assert max_err < 5e-2, max_err

    print("KERNEL_OK")
</pallas_src>

<mosaic_0001>
module attributes {stable_mosaic.version = 11 : i64} {
  func.func @_encoder_kernel(%arg0: i32, %arg1: i32, %arg2: memref<1x8x32xf32, #tpu.memory_space<vmem>>, %arg3: memref<1x4x8x8xf32, #tpu.memory_space<vmem>>, %arg4: memref<1x1x32xf32, #tpu.memory_space<vmem>>, %arg5: memref<1x32x96xbf16, #tpu.memory_space<vmem>>, %arg6: memref<1x32x32xbf16, #tpu.memory_space<vmem>>, %arg7: memref<1x1x32xf32, #tpu.memory_space<vmem>>, %arg8: memref<1x32x128xbf16, #tpu.memory_space<vmem>>, %arg9: memref<1x64x32xbf16, #tpu.memory_space<vmem>>, %arg10: memref<1x32xf32, #tpu.memory_space<vmem>>, %arg11: memref<1x8x32xf32, #tpu.memory_space<vmem>>, %arg12: memref<8x32xf32, #tpu.memory_space<vmem>>, %arg13: memref<8x32xf32, #tpu.memory_space<vmem>>) attributes {dimension_semantics = [#tpu.dimension_semantics<parallel>, #tpu.dimension_semantics<arbitrary>], iteration_bounds = array<i64: 2, 2>, scalar_prefetch = 0 : i64, scratch_operands = 2 : i64, tpu.core_type = #tpu.core_type<tc>, window_params = [{transform_indices = @transform_0, window_bounds = array<i64: 1, 8, 32>}, {transform_indices = @transform_1, window_bounds = array<i64: 1, 4, 8, 8>}, {transform_indices = @transform_2, window_bounds = array<i64: 1, 1, 32>}, {transform_indices = @transform_3, window_bounds = array<i64: 1, 32, 96>}, {transform_indices = @transform_4, window_bounds = array<i64: 1, 32, 32>}, {transform_indices = @transform_5, window_bounds = array<i64: 1, 1, 32>}, {transform_indices = @transform_6, window_bounds = array<i64: 1, 32, 128>}, {transform_indices = @transform_7, window_bounds = array<i64: 1, 64, 32>}, {pipeline_mode = #tpu.pipeline_mode<synchronous>, transform_indices = @transform_8, window_bounds = array<i64: 1, 32>}, {transform_indices = @transform_9, window_bounds = array<i64: 1, 8, 32>}]} {
    %c0_i32 = arith.constant 0 : i32
    %0 = arith.cmpi eq, %arg1, %c0_i32 : i32
    %1 = arith.extui %0 : i1 to i32
    %c0_i32_0 = arith.constant 0 : i32
    %2 = arith.cmpi ne, %1, %c0_i32_0 : i32
    scf.if %2 {
      %c0_72 = arith.constant 0 : index
      %c0_73 = arith.constant 0 : index
      %c0_74 = arith.constant 0 : index
      %166 = vector.load %arg2[%c0_72, %c0_73, %c0_74] : memref<1x8x32xf32, #tpu.memory_space<vmem>>, vector<1x8x32xf32>
      %167 = vector.shape_cast %166 : vector<1x8x32xf32> to vector<8x32xf32>
      %c0_75 = arith.constant 0 : index
      %c0_76 = arith.constant 0 : index
      %168 = vector.load %arg12[%c0_75, %c0_76] : memref<8x32xf32, #tpu.memory_space<vmem>>, vector<8x32xf32>
      tpu.vector_store %arg12[%c0_75, %c0_76], %167 {strides = array<i32>} : memref<8x32xf32, #tpu.memory_space<vmem>>, vector<8x32xf32>,
    } else {
    }
    %c0 = arith.constant 0 : index
    %c0_1 = arith.constant 0 : index
    %3 = vector.load %arg12[%c0, %c0_1] : memref<8x32xf32, #tpu.memory_space<vmem>>, vector<8x32xf32>
    %c0_2 = arith.constant 0 : index
    %c0_3 = arith.constant 0 : index
    %c0_4 = arith.constant 0 : index
    %4 = vector.load %arg4[%c0_2, %c0_3, %c0_4] : memref<1x1x32xf32, #tpu.memory_space<vmem>>, vector<1x1x32xf32>
    %5 = vector.shape_cast %4 : vector<1x1x32xf32> to vector<1x32xf32>
    %6 = arith.mulf %3, %3 : vector<8x32xf32>
    %cst = arith.constant dense<0.000000e+00> : vector<8xf32>
    %7 = vector.multi_reduction <add>, %6, %cst [1] : vector<8x32xf32> to vector<8xf32>
    %8 = vector.shape_cast %7 : vector<8xf32> to vector<8x1xf32>
    %cst_5 = arith.constant 3.200000e+01 : f32
    %9 = vector.broadcast %cst_5 : f32 to vector<8x1xf32>
    %10 = arith.divf %8, %9 : vector<8x1xf32>
    %cst_6 = arith.constant 9.99999997E-7 : f32
    %11 = vector.broadcast %cst_6 : f32 to vector<8x1xf32>
    %12 = arith.addf %10, %11 : vector<8x1xf32>
    %13 = math.rsqrt %12 : vector<8x1xf32>
    %14 = vector.broadcast %13 : vector<8x1xf32> to vector<8x32xf32>
    %15 = arith.mulf %3, %14 : vector<8x32xf32>
    %16 = vector.broadcast %5 : vector<1x32xf32> to vector<8x32xf32>
    %17 = arith.mulf %15, %16 : vector<8x32xf32>
    %18 = arith.truncf %17 : vector<8x32xf32> to vector<8x32xbf16>
    %c0_7 = arith.constant 0 : index
    %c0_8 = arith.constant 0 : index
    %c0_9 = arith.constant 0 : index
    %19 = vector.load %arg5[%c0_7, %c0_8, %c0_9] : memref<1x32x96xbf16, #tpu.memory_space<vmem>>, vector<1x32x96xbf16>
    %20 = vector.shape_cast %19 : vector<1x32x96xbf16> to vector<32x96xbf16>
    %cst_10 = arith.constant dense<0.000000e+00> : vector<8x96xf32>
    %21 = tpu.matmul %18, %20, %cst_10 {dimension_numbers = #tpu.dot_dimension_numbers<[1], [0], [0], [1], [0, 0, 1, 1], [], []>} : vector<8x32xbf16>, vector<32x96xbf16>, vector<8x96xf32> -> vector<8x96xf32>
    %22 = vector.extract_strided_slice %21 {offsets = [0, 0], sizes = [8, 32], strides = [1, 1]} : vector<8x96xf32> to vector<8x32xf32>
    %23 = vector.extract_strided_slice %21 {offsets = [0, 32], sizes = [8, 32], strides = [1, 1]} : vector<8x96xf32> to vector<8x32xf32>
    %24 = vector.extract_strided_slice %21 {offsets = [0, 64], sizes = [8, 32], strides = [1, 1]} : vector<8x96xf32> to vector<8x32xf32>
    %25 = vector.extract_strided_slice %22 {offsets = [0, 0], sizes = [8, 8], strides = [1, 1]} : vector<8x32xf32> to vector<8x8xf32>
    %26 = arith.truncf %25 : vector<8x8xf32> to vector<8x8xbf16>
    %27 = vector.extract_strided_slice %23 {offsets = [0, 0], sizes = [8, 8], strides = [1, 1]} : vector<8x32xf32> to vector<8x8xf32>
    %28 = arith.truncf %27 : vector<8x8xf32> to vector<8x8xbf16>
    %cst_11 = arith.constant dense<0.000000e+00> : vector<8x8xf32>
    %29 = tpu.matmul %26, %28, %cst_11 {dimension_numbers = #tpu.dot_dimension_numbers<[1], [1], [0], [0], [0, 0, 1, 0], [], []>} : vector<8x8xbf16>, vector<8x8xbf16>, vector<8x8xf32> -> vector<8x8xf32>
    %c0_12 = arith.constant 0 : index
    %c0_13 = arith.constant 0 : index
    %c0_14 = arith.constant 0 : index
    %c0_15 = arith.constant 0 : index
    %30 = vector.load %arg3[%c0_12, %c0_13, %c0_14, %c0_15] : memref<1x4x8x8xf32, #tpu.memory_space<vmem>>, vector<1x1x8x8xf32>
    %31 = vector.shape_cast %30 : vector<1x1x8x8xf32> to vector<8x8xf32>
    %32 = arith.addf %29, %31 : vector<8x8xf32>
    %cst_16 = arith.constant dense<0xFF800000> : vector<8xf32>
    %33 = vector.multi_reduction <maximumf>, %32, %cst_16 [1] : vector<8x8xf32> to vector<8xf32>
    %34 = vector.shape_cast %33 : vector<8xf32> to vector<8x1xf32>
    %35 = vector.broadcast %34 : vector<8x1xf32> to vector<8x8xf32>
    %36 = arith.subf %32, %35 : vector<8x8xf32>
    %37 = math.exp %36 : vector<8x8xf32>
    %cst_17 = arith.constant dense<0.000000e+00> : vector<8xf32>
    %38 = vector.multi_reduction <add>, %37, %cst_17 [1] : vector<8x8xf32> to vector<8xf32>
    %39 = vector.shape_cast %38 : vector<8xf32> to vector<8x1xf32>
    %40 = tpu.reciprocal %39 {approx = true} : vector<8x1xf32> -> vector<8x1xf32>
    %41 = vector.broadcast %40 : vector<8x1xf32> to vector<8x8xf32>
    %42 = arith.mulf %37, %41 : vector<8x8xf32>
    %43 = arith.truncf %42 : vector<8x8xf32> to vector<8x8xbf16>
    %44 = vector.extract_strided_slice %24 {offsets = [0, 0], sizes = [8, 8], strides = [1, 1]} : vector<8x32xf32> to vector<8x8xf32>
    %45 = arith.truncf %44 : vector<8x8xf32> to vector<8x8xbf16>
    %cst_18 = arith.constant dense<0.000000e+00> : vector<8x8xf32>
    %46 = tpu.matmul %43, %45, %cst_18 {dimension_numbers = #tpu.dot_dimension_numbers<[1], [0], [0], [1], [0, 0, 1, 1], [], []>} : vector<8x8xbf16>, vector<8x8xbf16>, vector<8x8xf32> -> vector<8x8xf32>
    %c0_19 = arith.constant 0 : index
    %c0_20 = arith.constant 0 : index
    %47 = vector.load %arg13[%c0_19, %c0_20] : memref<8x32xf32, #tpu.memory_space<vmem>>, vector<8x8xf32>
    tpu.vector_store %arg13[%c0_19, %c0_20], %46 {strides = array<i32>} : memref<8x32xf32, #tpu.memory_space<vmem>>, vector<8x8xf32>,
    %48 = vector.extract_strided_slice %22 {offsets = [0, 8], sizes = [8, 8], strides = [1, 1]} : vector<8x32xf32> to vector<8x8xf32>
    %49 = arith.truncf %48 : vector<8x8xf32> to vector<8x8xbf16>
    %50 = vector.extract_strided_slice %23 {offsets = [0, 8], sizes = [8, 8], strides = [1, 1]} : vector<8x32xf32> to vector<8x8xf32>
    %51 = arith.truncf %50 : vector<8x8xf32> to vector<8x8xbf16>
    %cst_21 = arith.constant dense<0.000000e+00> : vector<8x8xf32>
    %52 = tpu.matmul %49, %51, %cst_21 {dimension_numbers = #tpu.dot_dimension_numbers<[1], [1], [0], [0], [0, 0, 1, 0], [], []>} : vector<8x8xbf16>, vector<8x8xbf16>, vector<8x8xf32> -> vector<8x8xf32>
    %c0_22 = arith.constant 0 : index
    %c1 = arith.constant 1 : index
    %c0_23 = arith.constant 0 : index
    %c0_24 = arith.constant 0 : index
    %53 = vector.load %arg3[%c0_22, %c1, %c0_23, %c0_24] : memref<1x4x8x8xf32, #tpu.memory_space<vmem>>, vector<1x1x8x8xf32>
    %54 = vector.shape_cast %53 : vector<1x1x8x8xf32> to vector<8x8xf32>
    %55 = arith.addf %52, %54 : vector<8x8xf32>
    %cst_25 = arith.constant dense<0xFF800000> : vector<8xf32>
    %56 = vector.multi_reduction <maximumf>, %55, %cst_25 [1] : vector<8x8xf32> to vector<8xf32>
    %57 = vector.shape_cast %56 : vector<8xf32> to vector<8x1xf32>
    %58 = vector.broadcast %57 : vector<8x1xf32> to vector<8x8xf32>
    %59 = arith.subf %55, %58 : vector<8x8xf32>
    %60 = math.exp %59 : vector<8x8xf32>
    %cst_26 = arith.constant dense<0.000000e+00> : vector<8xf32>
    %61 = vector.multi_reduction <add>, %60, %cst_26 [1] : vector<8x8xf32> to vector<8xf32>
    %62 = vector.shape_cast %61 : vector<8xf32> to vector<8x1xf32>
    %63 = tpu.reciprocal %62 {approx = true} : vector<8x1xf32> -> vector<8x1xf32>
    %64 = vector.broadcast %63 : vector<8x1xf32> to vector<8x8xf32>
    %65 = arith.mulf %60, %64 : vector<8x8xf32>
    %66 = arith.truncf %65 : vector<8x8xf32> to vector<8x8xbf16>
    %67 = vector.extract_strided_slice %24 {offsets = [0, 8], sizes = [8, 8], strides = [1, 1]} : vector<8x32xf32> to vector<8x8xf32>
    %68 = arith.truncf %67 : vector<8x8xf32> to vector<8x8xbf16>
    %cst_27 = arith.constant dense<0.000000e+00> : vector<8x8xf32>
    %69 = tpu.matmul %66, %68, %cst_27 {dimension_numbers = #tpu.dot_dimension_numbers<[1], [0], [0], [1], [0, 0, 1, 1], [], []>} : vector<8x8xbf16>, vector<8x8xbf16>, vector<8x8xf32> -> vector<8x8xf32>
    %c0_28 = arith.constant 0 : index
    %c8 = arith.constant 8 : index
    %70 = vector.load %arg13[%c0_28, %c8] : memref<8x32xf32, #tpu.memory_space<vmem>>, vector<8x8xf32>
    tpu.vector_store %arg13[%c0_28, %c8], %69 {strides = array<i32>} : memref<8x32xf32, #tpu.memory_space<vmem>>, vector<8x8xf32>,
    %71 = vector.extract_strided_slice %22 {offsets = [0, 16], sizes = [8, 8], strides = [1, 1]} : vector<8x32xf32> to vector<8x8xf32>
    %72 = arith.truncf %71 : vector<8x8xf32> to vector<8x8xbf16>
    %73 = vector.extract_strided_slice %23 {offsets = [0, 16], sizes = [8, 8], strides = [1, 1]} : vector<8x32xf32> to vector<8x8xf32>
    %74 = arith.truncf %73 : vector<8x8xf32> to vector<8x8xbf16>
    %cst_29 = arith.constant dense<0.000000e+00> : vector<8x8xf32>
    %75 = tpu.matmul %72, %74, %cst_29 {dimension_numbers = #tpu.dot_dimension_numbers<[1], [1], [0], [0], [0, 0, 1, 0], [], []>} : vector<8x8xbf16>, vector<8x8xbf16>, vector<8x8xf32> -> vector<8x8xf32>
    %c0_30 = arith.constant 0 : index
    %c2 = arith.constant 2 : index
    %c0_31 = arith.constant 0 : index
    %c0_32 = arith.constant 0 : index
    %76 = vector.load %arg3[%c0_30, %c2, %c0_31, %c0_32] : memref<1x4x8x8xf32, #tpu.memory_space<vmem>>, vector<1x1x8x8xf32>
    %77 = vector.shape_cast %76 : vector<1x1x8x8xf32> to vector<8x8xf32>
    %78 = arith.addf %75, %77 : vector<8x8xf32>
    %cst_33 = arith.constant dense<0xFF800000> : vector<8xf32>
    %79 = vector.multi_reduction <maximumf>, %78, %cst_33 [1] : vector<8x8xf32> to vector<8xf32>
    %80 = vector.shape_cast %79 : vector<8xf32> to vector<8x1xf32>
    %81 = vector.broadcast %80 : vector<8x1xf32> to vector<8x8xf32>
    %82 = arith.subf %78, %81 : vector<8x8xf32>
    %83 = math.exp %82 : vector<8x8xf32>
    %cst_34 = arith.constant dense<0.000000e+00> : vector<8xf32>
    %84 = vector.multi_reduction <add>, %83, %cst_34 [1] : vector<8x8xf32> to vector<8xf32>
    %85 = vector.shape_cast %84 : vector<8xf32> to vector<8x1xf32>
    %86 = tpu.reciprocal %85 {approx = true} : vector<8x1xf32> -> vector<8x1xf32>
    %87 = vector.broadcast %86 : vector<8x1xf32> to vector<8x8xf32>
    %88 = arith.mulf %83, %87 : vector<8x8xf32>
    %89 = arith.truncf %88 : vector<8x8xf32> to vector<8x8xbf16>
    %90 = vector.extract_strided_slice %24 {offsets = [0, 16], sizes = [8, 8], strides = [1, 1]} : vector<8x32xf32> to vector<8x8xf32>
    %91 = arith.truncf %90 : vector<8x8xf32> to vector<8x8xbf16>
    %cst_35 = arith.constant dense<0.000000e+00> : vector<8x8xf32>
    %92 = tpu.matmul %89, %91, %cst_35 {dimension_numbers = #tpu.dot_dimension_numbers<[1], [0], [0], [1], [0, 0, 1, 1], [], []>} : vector<8x8xbf16>, vector<8x8xbf16>, vector<8x8xf32> -> vector<8x8xf32>
    %c0_36 = arith.constant 0 : index
    %c16 = arith.constant 16 : index
    %93 = vector.load %arg13[%c0_36, %c16] : memref<8x32xf32, #tpu.memory_space<vmem>>, vector<8x8xf32>
    tpu.vector_store %arg13[%c0_36, %c16], %92 {strides = array<i32>} : memref<8x32xf32, #tpu.memory_space<vmem>>, vector<8x8xf32>,
    %94 = vector.extract_strided_slice %22 {offsets = [0, 24], sizes = [8, 8], strides = [1, 1]} : vector<8x32xf32> to vector<8x8xf32>
    %95 = arith.truncf %94 : vector<8x8xf32> to vector<8x8xbf16>
    %96 = vector.extract_strided_slice %23 {offsets = [0, 24], sizes = [8, 8], strides = [1, 1]} : vector<8x32xf32> to vector<8x8xf32>
    %97 = arith.truncf %96 : vector<8x8xf32> to vector<8x8xbf16>
    %cst_37 = arith.constant dense<0.000000e+00> : vector<8x8xf32>
    %98 = tpu.matmul %95, %97, %cst_37 {dimension_numbers = #tpu.dot_dimension_numbers<[1], [1], [0], [0], [0, 0, 1, 0], [], []>} : vector<8x8xbf16>, vector<8x8xbf16>, vector<8x8xf32> -> vector<8x8xf32>
    %c0_38 = arith.constant 0 : index
    %c3 = arith.constant 3 : index
    %c0_39 = arith.constant 0 : index
    %c0_40 = arith.constant 0 : index
    %99 = vector.load %arg3[%c0_38, %c3, %c0_39, %c0_40] : memref<1x4x8x8xf32, #tpu.memory_space<vmem>>, vector<1x1x8x8xf32>
    %100 = vector.shape_cast %99 : vector<1x1x8x8xf32> to vector<8x8xf32>
    %101 = arith.addf %98, %100 : vector<8x8xf32>
    %cst_41 = arith.constant dense<0xFF800000> : vector<8xf32>
    %102 = vector.multi_reduction <maximumf>, %101, %cst_41 [1] : vector<8x8xf32> to vector<8xf32>
    %103 = vector.shape_cast %102 : vector<8xf32> to vector<8x1xf32>
    %104 = vector.broadcast %103 : vector<8x1xf32> to vector<8x8xf32>
    %105 = arith.subf %101, %104 : vector<8x8xf32>
    %106 = math.exp %105 : vector<8x8xf32>
    %cst_42 = arith.constant dense<0.000000e+00> : vector<8xf32>
    %107 = vector.multi_reduction <add>, %106, %cst_42 [1] : vector<8x8xf32> to vector<8xf32>
    %108 = vector.shape_cast %107 : vector<8xf32> to vector<8x1xf32>
    %109 = tpu.reciprocal %108 {approx = true} : vector<8x1xf32> -> vector<8x1xf32>
    %110 = vector.broadcast %109 : vector<8x1xf32> to vector<8x8xf32>
    %111 = arith.mulf %106, %110 : vector<8x8xf32>
    %112 = arith.truncf %111 : vector<8x8xf32> to vector<8x8xbf16>
    %113 = vector.extract_strided_slice %24 {offsets = [0, 24], sizes = [8, 8], strides = [1, 1]} : vector<8x32xf32> to vector<8x8xf32>
    %114 = arith.truncf %113 : vector<8x8xf32> to vector<8x8xbf16>
    %cst_43 = arith.constant dense<0.000000e+00> : vector<8x8xf32>
    %115 = tpu.matmul %112, %114, %cst_43 {dimension_numbers = #tpu.dot_dimension_numbers<[1], [0], [0], [1], [0, 0, 1, 1], [], []>} : vector<8x8xbf16>, vector<8x8xbf16>, vector<8x8xf32> -> vector<8x8xf32>
    %c0_44 = arith.constant 0 : index
    %c24 = arith.constant 24 : index
    %116 = vector.load %arg13[%c0_44, %c24] : memref<8x32xf32, #tpu.memory_space<vmem>>, vector<8x8xf32>
    tpu.vector_store %arg13[%c0_44, %c24], %115 {strides = array<i32>} : memref<8x32xf32, #tpu.memory_space<vmem>>, vector<8x8xf32>,
    %c0_45 = arith.constant 0 : index
    %c0_46 = arith.constant 0 : index
    %117 = vector.load %arg13[%c0_45, %c0_46] : memref<8x32xf32, #tpu.memory_space<vmem>>, vector<8x32xf32>
    %118 = arith.truncf %117 : vector<8x32xf32> to vector<8x32xbf16>
    %c0_47 = arith.constant 0 : index
    %c0_48 = arith.constant 0 : index
    %c0_49 = arith.constant 0 : index
    %119 = vector.load %arg6[%c0_47, %c0_48, %c0_49] : memref<1x32x32xbf16, #tpu.memory_space<vmem>>, vector<1x32x32xbf16>
    %120 = vector.shape_cast %119 : vector<1x32x32xbf16> to vector<32x32xbf16>
    %cst_50 = arith.constant dense<0.000000e+00> : vector<8x32xf32>
    %121 = tpu.matmul %118, %120, %cst_50 {dimension_numbers = #tpu.dot_dimension_numbers<[1], [0], [0], [1], [0, 0, 1, 1], [], []>} : vector<8x32xbf16>, vector<32x32xbf16>, vector<8x32xf32> -> vector<8x32xf32>
    %122 = arith.addf %3, %121 : vector<8x32xf32>
    %c0_51 = arith.constant 0 : index
    %c0_52 = arith.constant 0 : index
    %c0_53 = arith.constant 0 : index
    %123 = vector.load %arg7[%c0_51, %c0_52, %c0_53] : memref<1x1x32xf32, #tpu.memory_space<vmem>>, vector<1x1x32xf32>
    %124 = vector.shape_cast %123 : vector<1x1x32xf32> to vector<1x32xf32>
    %125 = arith.mulf %122, %122 : vector<8x32xf32>
    %cst_54 = arith.constant dense<0.000000e+00> : vector<8xf32>
    %126 = vector.multi_reduction <add>, %125, %cst_54 [1] : vector<8x32xf32> to vector<8xf32>
    %127 = vector.shape_cast %126 : vector<8xf32> to vector<8x1xf32>
    %cst_55 = arith.constant 3.200000e+01 : f32
    %128 = vector.broadcast %cst_55 : f32 to vector<8x1xf32>
    %129 = arith.divf %127, %128 : vector<8x1xf32>
    %cst_56 = arith.constant 9.99999997E-7 : f32
    %130 = vector.broadcast %cst_56 : f32 to vector<8x1xf32>
    %131 = arith.addf %129, %130 : vector<8x1xf32>
    %132 = math.rsqrt %131 : vector<8x1xf32>
    %133 = vector.broadcast %132 : vector<8x1xf32> to vector<8x32xf32>
    %134 = arith.mulf %122, %133 : vector<8x32xf32>
    %135 = vector.broadcast %124 : vector<1x32xf32> to vector<8x32xf32>
    %136 = arith.mulf %134, %135 : vector<8x32xf32>
    %137 = arith.truncf %136 : vector<8x32xf32> to vector<8x32xbf16>
    %c0_57 = arith.constant 0 : index
    %c0_58 = arith.constant 0 : index
    %c0_59 = arith.constant 0 : index
    %138 = vector.load %arg8[%c0_57, %c0_58, %c0_59] : memref<1x32x128xbf16, #tpu.memory_space<vmem>>, vector<1x32x128xbf16>
    %139 = vector.shape_cast %138 : vector<1x32x128xbf16> to vector<32x128xbf16>
    %cst_60 = arith.constant dense<0.000000e+00> : vector<8x128xf32>
    %140 = tpu.matmul %137, %139, %cst_60 {dimension_numbers = #tpu.dot_dimension_numbers<[1], [0], [0], [1], [0, 0, 1, 1], [], []>} : vector<8x32xbf16>, vector<32x128xbf16>, vector<8x128xf32> -> vector<8x128xf32>
    %141 = vector.extract_strided_slice %140 {offsets = [0, 0], sizes = [8, 64], strides = [1, 1]} : vector<8x128xf32> to vector<8x64xf32>
    %cst_61 = arith.constant 5.000000e-01 : f32
    %142 = vector.broadcast %cst_61 : f32 to vector<8x64xf32>
    %143 = arith.mulf %142, %141 : vector<8x64xf32>
    %cst_62 = arith.constant 4.471500e-02 : f32
    %144 = vector.broadcast %cst_62 : f32 to vector<8x64xf32>
    %145 = arith.mulf %144, %141 : vector<8x64xf32>
    %146 = arith.mulf %145, %141 : vector<8x64xf32>
    %147 = arith.mulf %146, %141 : vector<8x64xf32>
    %148 = arith.addf %141, %147 : vector<8x64xf32>
    %cst_63 = arith.constant 0.797884583 : f32
    %149 = vector.broadcast %cst_63 : f32 to vector<8x64xf32>
    %150 = arith.mulf %149, %148 : vector<8x64xf32>
    %151 = math.tanh %150 : vector<8x64xf32>
    %cst_64 = arith.constant 1.000000e+00 : f32
    %152 = vector.broadcast %cst_64 : f32 to vector<8x64xf32>
    %153 = arith.addf %152, %151 : vector<8x64xf32>
    %154 = arith.mulf %143, %153 : vector<8x64xf32>
    %155 = vector.extract_strided_slice %140 {offsets = [0, 64], sizes = [8, 64], strides = [1, 1]} : vector<8x128xf32> to vector<8x64xf32>
    %156 = arith.mulf %154, %155 : vector<8x64xf32>
    %157 = arith.truncf %156 : vector<8x64xf32> to vector<8x64xbf16>
    %c0_65 = arith.constant 0 : index
    %c0_66 = arith.constant 0 : index
    %c0_67 = arith.constant 0 : index
    %158 = vector.load %arg9[%c0_65, %c0_66, %c0_67] : memref<1x64x32xbf16, #tpu.memory_space<vmem>>, vector<1x64x32xbf16>
    %159 = vector.shape_cast %158 : vector<1x64x32xbf16> to vector<64x32xbf16>
    %cst_68 = arith.constant dense<0.000000e+00> : vector<8x32xf32>
    %160 = tpu.matmul %157, %159, %cst_68 {dimension_numbers = #tpu.dot_dimension_numbers<[1], [0], [0], [1], [0, 0, 1, 1], [], []>} : vector<8x64xbf16>, vector<64x32xbf16>, vector<8x32xf32> -> vector<8x32xf32>
    %161 = arith.addf %122, %160 : vector<8x32xf32>
    %c0_69 = arith.constant 0 : index
    %c0_70 = arith.constant 0 : index
    %162 = vector.load %arg12[%c0_69, %c0_70] : memref<8x32xf32, #tpu.memory_space<vmem>>, vector<8x32xf32>
    tpu.vector_store %arg12[%c0_69, %c0_70], %161 {strides = array<i32>} : memref<8x32xf32, #tpu.memory_space<vmem>>, vector<8x32xf32>,
    %c1_i32 = arith.constant 1 : i32
    %163 = arith.cmpi eq, %arg1, %c1_i32 : i32
    %164 = arith.extui %163 : i1 to i32
    %c0_i32_71 = arith.constant 0 : i32
    %165 = arith.cmpi ne, %164, %c0_i32_71 : i32
    scf.if %165 {
      %c0_72 = arith.constant 0 : index
      %c0_73 = arith.constant 0 : index
      %166 = vector.load %arg10[%c0_72, %c0_73] : memref<1x32xf32, #tpu.memory_space<vmem>>, vector<1x32xf32>
      %167 = arith.mulf %161, %161 : vector<8x32xf32>
      %cst_74 = arith.constant dense<0.000000e+00> : vector<8xf32>
      %168 = vector.multi_reduction <add>, %167, %cst_74 [1] : vector<8x32xf32> to vector<8xf32>
      %169 = vector.shape_cast %168 : vector<8xf32> to vector<8x1xf32>
      %cst_75 = arith.constant 3.200000e+01 : f32
      %170 = vector.broadcast %cst_75 : f32 to vector<8x1xf32>
      %171 = arith.divf %169, %170 : vector<8x1xf32>
      %cst_76 = arith.constant 9.99999997E-7 : f32
      %172 = vector.broadcast %cst_76 : f32 to vector<8x1xf32>
      %173 = arith.addf %171, %172 : vector<8x1xf32>
      %174 = math.rsqrt %173 : vector<8x1xf32>
      %175 = vector.broadcast %174 : vector<8x1xf32> to vector<8x32xf32>
      %176 = arith.mulf %161, %175 : vector<8x32xf32>
      %177 = vector.broadcast %166 : vector<1x32xf32> to vector<8x32xf32>
      %178 = arith.mulf %176, %177 : vector<8x32xf32>
      %c0_77 = arith.constant 0 : index
      %c0_78 = arith.constant 0 : index
      %c0_79 = arith.constant 0 : index
      %179 = vector.load %arg11[%c0_77, %c0_78, %c0_79] : memref<1x8x32xf32, #tpu.memory_space<vmem>>, vector<1x8x32xf32>
      %180 = vector.shape_cast %179 : vector<1x8x32xf32> to vector<8x32xf32>
      %181 = vector.shape_cast %178 : vector<8x32xf32> to vector<1x8x32xf32>
      tpu.vector_store %arg11[%c0_77, %c0_78, %c0_79], %181 {strides = array<i32>} : memref<1x8x32xf32, #tpu.memory_space<vmem>>, vector<1x8x32xf32>,
    } else {
    }
    return
  }
  func.func @transform_0(%arg0: i32, %arg1: i32) -> (i32, i32, i32) {
    %c0_i32 = arith.constant 0 : i32
    %c0_i32_0 = arith.constant 0 : i32
    %c0_i32_1 = arith.constant 0 : i32
    return %arg0, %c0_i32, %c0_i32_0 : i32, i32, i32
  }
  func.func @transform_1(%arg0: i32, %arg1: i32) -> (i32, i32, i32, i32) {
    %c0_i32 = arith.constant 0 : i32
    %c0_i32_0 = arith.constant 0 : i32
    %c0_i32_1 = arith.constant 0 : i32
    %c0_i32_2 = arith.constant 0 : i32
    return %arg0, %c0_i32, %c0_i32_0, %c0_i32_1 : i32, i32, i32, i32
  }
  func.func @transform_2(%arg0: i32, %arg1: i32) -> (i32, i32, i32) {
    %c0_i32 = arith.constant 0 : i32
    %c0_i32_0 = arith.constant 0 : i32
    %c0_i32_1 = arith.constant 0 : i32
    return %arg1, %c0_i32, %c0_i32_0 : i32, i32, i32
  }
  func.func @transform_3(%arg0: i32, %arg1: i32) -> (i32, i32, i32) {
    %c0_i32 = arith.constant 0 : i32
    %c0_i32_0 = arith.constant 0 : i32
    %c0_i32_1 = arith.constant 0 : i32
    return %arg1, %c0_i32, %c0_i32_0 : i32, i32, i32
  }
  func.func @transform_4(%arg0: i32, %arg1: i32) -> (i32, i32, i32) {
    %c0_i32 = arith.constant 0 : i32
    %c0_i32_0 = arith.constant 0 : i32
    %c0_i32_1 = arith.constant 0 : i32
    return %arg1, %c0_i32, %c0_i32_0 : i32, i32, i32
  }
  func.func @transform_5(%arg0: i32, %arg1: i32) -> (i32, i32, i32) {
    %c0_i32 = arith.constant 0 : i32
    %c0_i32_0 = arith.constant 0 : i32
    %c0_i32_1 = arith.constant 0 : i32
    return %arg1, %c0_i32, %c0_i32_0 : i32, i32, i32
  }
  func.func @transform_6(%arg0: i32, %arg1: i32) -> (i32, i32, i32) {
    %c0_i32 = arith.constant 0 : i32
    %c0_i32_0 = arith.constant 0 : i32
    %c0_i32_1 = arith.constant 0 : i32
    return %arg1, %c0_i32, %c0_i32_0 : i32, i32, i32
  }
  func.func @transform_7(%arg0: i32, %arg1: i32) -> (i32, i32, i32) {
    %c0_i32 = arith.constant 0 : i32
    %c0_i32_0 = arith.constant 0 : i32
    %c0_i32_1 = arith.constant 0 : i32
    return %arg1, %c0_i32, %c0_i32_0 : i32, i32, i32
  }
  func.func @transform_8(%arg0: i32, %arg1: i32) -> (i32, i32) {
    %c0_i32 = arith.constant 0 : i32
    %c0_i32_0 = arith.constant 0 : i32
    %c0_i32_1 = arith.constant 0 : i32
    return %c0_i32, %c0_i32_0 : i32, i32
  }
  func.func @transform_9(%arg0: i32, %arg1: i32) -> (i32, i32, i32) {
    %c0_i32 = arith.constant 0 : i32
    %c0_i32_0 = arith.constant 0 : i32
    %c0_i32_1 = arith.constant 0 : i32
    return %arg0, %c0_i32, %c0_i32_0 : i32, i32, i32
  }
}

module attributes {stable_mosaic.version = 11 : i64} {
  func.func @_decoder_kernel(%arg0: i32, %arg1: i32, %arg2: memref<1x1x32xf32, #tpu.memory_space<vmem>>, %arg3: memref<1x8x32xf32, #tpu.memory_space<vmem>>, %arg4: memref<4x1x1xf32, #tpu.memory_space<vmem>>, %arg5: memref<1x1x8xf32, #tpu.memory_space<vmem>>, %arg6: memref<1x1x32xf32, #tpu.memory_space<vmem>>, %arg7: memref<1x32x96xbf16, #tpu.memory_space<vmem>>, %arg8: memref<1x32x32xbf16, #tpu.memory_space<vmem>>, %arg9: memref<1x1x32xf32, #tpu.memory_space<vmem>>, %arg10: memref<1x32x32xbf16, #tpu.memory_space<vmem>>, %arg11: memref<1x32x64xbf16, #tpu.memory_space<vmem>>, %arg12: memref<1x32x32xbf16, #tpu.memory_space<vmem>>, %arg13: memref<1x1x32xf32, #tpu.memory_space<vmem>>, %arg14: memref<1x32x128xbf16, #tpu.memory_space<vmem>>, %arg15: memref<1x64x32xbf16, #tpu.memory_space<vmem>>, %arg16: memref<1x32xf32, #tpu.memory_space<vmem>>, %arg17: memref<32x128xbf16, #tpu.memory_space<vmem>>, %arg18: memref<1x1x128xf32, #tpu.memory_space<vmem>>, %arg19: memref<1x32xf32, #tpu.memory_space<vmem>>, %arg20: memref<1x32xf32, #tpu.memory_space<vmem>>) attributes {dimension_semantics = [#tpu.dimension_semantics<parallel>, #tpu.dimension_semantics<arbitrary>], iteration_bounds = array<i64: 2, 2>, scalar_prefetch = 0 : i64, scratch_operands = 2 : i64, tpu.core_type = #tpu.core_type<tc>, window_params = [{transform_indices = @transform_0, window_bounds = array<i64: 1, 1, 32>}, {transform_indices = @transform_1, window_bounds = array<i64: 1, 8, 32>}, {pipeline_mode = #tpu.pipeline_mode<synchronous>, transform_indices = @transform_2, window_bounds = array<i64: 4, 1, 1>}, {transform_indices = @transform_3, window_bounds = array<i64: 1, 1, 8>}, {transform_indices = @transform_4, window_bounds = array<i64: 1, 1, 32>}, {transform_indices = @transform_5, window_bounds = array<i64: 1, 32, 96>}, {transform_indices = @transform_6, window_bounds = array<i64: 1, 32, 32>}, {transform_indices = @transform_7, window_bounds = array<i64: 1, 1, 32>}, {transform_indices = @transform_8, window_bounds = array<i64: 1, 32, 32>}, {transform_indices = @transform_9, window_bounds = array<i64: 1, 32, 64>}, {transform_indices = @transform_10, window_bounds = array<i64: 1, 32, 32>}, {transform_indices = @transform_11, window_bounds = array<i64: 1, 1, 32>}, {transform_indices = @transform_12, window_bounds = array<i64: 1, 32, 128>}, {transform_indices = @transform_13, window_bounds = array<i64: 1, 64, 32>}, {pipeline_mode = #tpu.pipeline_mode<synchronous>, transform_indices = @transform_14, window_bounds = array<i64: 1, 32>}, {pipeline_mode = #tpu.pipeline_mode<synchronous>, transform_indices = @transform_15, window_bounds = array<i64: 32, 128>}, {transform_indices = @transform_16, window_bounds = array<i64: 1, 1, 128>}]} {
    %c0_i32 = arith.constant 0 : i32
    %0 = arith.cmpi eq, %arg1, %c0_i32 : i32
    %1 = arith.extui %0 : i1 to i32
    %c0_i32_0 = arith.constant 0 : i32
    %2 = arith.cmpi ne, %1, %c0_i32_0 : i32
    scf.if %2 {
      %c0_83 = arith.constant 0 : index
      %c0_84 = arith.constant 0 : index
      %c0_85 = arith.constant 0 : index
      %186 = vector.load %arg2[%c0_83, %c0_84, %c0_85] : memref<1x1x32xf32, #tpu.memory_space<vmem>>, vector<1x1x32xf32>
      %187 = vector.shape_cast %186 : vector<1x1x32xf32> to vector<1x32xf32>
      %c0_86 = arith.constant 0 : index
      %c0_87 = arith.constant 0 : index
      %188 = vector.load %arg19[%c0_86, %c0_87] : memref<1x32xf32, #tpu.memory_space<vmem>>, vector<1x32xf32>
      tpu.vector_store %arg19[%c0_86, %c0_87], %187 {strides = array<i32>} : memref<1x32xf32, #tpu.memory_space<vmem>>, vector<1x32xf32>,
    } else {
    }
    %c0 = arith.constant 0 : index
    %c0_1 = arith.constant 0 : index
    %3 = vector.load %arg19[%c0, %c0_1] : memref<1x32xf32, #tpu.memory_space<vmem>>, vector<1x32xf32>
    %c0_2 = arith.constant 0 : index
    %c0_3 = arith.constant 0 : index
    %c0_4 = arith.constant 0 : index
    %4 = vector.load %arg3[%c0_2, %c0_3, %c0_4] : memref<1x8x32xf32, #tpu.memory_space<vmem>>, vector<1x8x32xf32>
    %5 = vector.shape_cast %4 : vector<1x8x32xf32> to vector<8x32xf32>
    %6 = arith.truncf %5 : vector<8x32xf32> to vector<8x32xbf16>
    %c0_5 = arith.constant 0 : index
    %c0_6 = arith.constant 0 : index
    %c0_7 = arith.constant 0 : index
    %7 = vector.load %arg6[%c0_5, %c0_6, %c0_7] : memref<1x1x32xf32, #tpu.memory_space<vmem>>, vector<1x1x32xf32>
    %8 = vector.shape_cast %7 : vector<1x1x32xf32> to vector<1x32xf32>
    %9 = arith.mulf %3, %3 : vector<1x32xf32>
    %cst = arith.constant dense<0.000000e+00> : vector<1xf32>
    %10 = vector.multi_reduction <add>, %9, %cst [1] : vector<1x32xf32> to vector<1xf32>
    %11 = vector.shape_cast %10 : vector<1xf32> to vector<1x1xf32>
    %cst_8 = arith.constant 3.200000e+01 : f32
    %12 = vector.broadcast %cst_8 : f32 to vector<1x1xf32>
    %13 = arith.divf %11, %12 : vector<1x1xf32>
    %cst_9 = arith.constant 9.99999997E-7 : f32
    %14 = vector.broadcast %cst_9 : f32 to vector<1x1xf32>
    %15 = arith.addf %13, %14 : vector<1x1xf32>
    %16 = math.rsqrt %15 : vector<1x1xf32>
    %17 = vector.broadcast %16 : vector<1x1xf32> to vector<1x32xf32>
    %18 = arith.mulf %3, %17 : vector<1x32xf32>
    %19 = arith.mulf %18, %8 : vector<1x32xf32>
    %20 = arith.truncf %19 : vector<1x32xf32> to vector<1x32xbf16>
    %c0_10 = arith.constant 0 : index
    %c0_11 = arith.constant 0 : index
    %c0_12 = arith.constant 0 : index
    %21 = vector.load %arg7[%c0_10, %c0_11, %c0_12] : memref<1x32x96xbf16, #tpu.memory_space<vmem>>, vector<1x32x96xbf16>
    %22 = vector.shape_cast %21 : vector<1x32x96xbf16> to vector<32x96xbf16>
    %23 = vector.extract_strided_slice %22 {offsets = [0, 64], sizes = [32, 32], strides = [1, 1]} : vector<32x96xbf16> to vector<32x32xbf16>
    %cst_13 = arith.constant dense<0.000000e+00> : vector<1x32xf32>
    %24 = tpu.matmul %20, %23, %cst_13 {dimension_numbers = #tpu.dot_dimension_numbers<[1], [0], [0], [1], [0, 0, 1, 1], [], []>} : vector<1x32xbf16>, vector<32x32xbf16>, vector<1x32xf32> -> vector<1x32xf32>
    %25 = arith.truncf %24 : vector<1x32xf32> to vector<1x32xbf16>
    %c0_14 = arith.constant 0 : index
    %c0_15 = arith.constant 0 : index
    %c0_16 = arith.constant 0 : index
    %26 = vector.load %arg8[%c0_14, %c0_15, %c0_16] : memref<1x32x32xbf16, #tpu.memory_space<vmem>>, vector<1x32x32xbf16>
    %27 = vector.shape_cast %26 : vector<1x32x32xbf16> to vector<32x32xbf16>
    %cst_17 = arith.constant dense<0.000000e+00> : vector<1x32xf32>
    %28 = tpu.matmul %25, %27, %cst_17 {dimension_numbers = #tpu.dot_dimension_numbers<[1], [0], [0], [1], [0, 0, 1, 1], [], []>} : vector<1x32xbf16>, vector<32x32xbf16>, vector<1x32xf32> -> vector<1x32xf32>
    %29 = arith.addf %3, %28 : vector<1x32xf32>
    %c0_18 = arith.constant 0 : index
    %c0_19 = arith.constant 0 : index
    %c0_20 = arith.constant 0 : index
    %30 = vector.load %arg9[%c0_18, %c0_19, %c0_20] : memref<1x1x32xf32, #tpu.memory_space<vmem>>, vector<1x1x32xf32>
    %31 = vector.shape_cast %30 : vector<1x1x32xf32> to vector<1x32xf32>
    %32 = arith.mulf %29, %29 : vector<1x32xf32>
    %cst_21 = arith.constant dense<0.000000e+00> : vector<1xf32>
    %33 = vector.multi_reduction <add>, %32, %cst_21 [1] : vector<1x32xf32> to vector<1xf32>
    %34 = vector.shape_cast %33 : vector<1xf32> to vector<1x1xf32>
    %cst_22 = arith.constant 3.200000e+01 : f32
    %35 = vector.broadcast %cst_22 : f32 to vector<1x1xf32>
    %36 = arith.divf %34, %35 : vector<1x1xf32>
    %cst_23 = arith.constant 9.99999997E-7 : f32
    %37 = vector.broadcast %cst_23 : f32 to vector<1x1xf32>
    %38 = arith.addf %36, %37 : vector<1x1xf32>
    %39 = math.rsqrt %38 : vector<1x1xf32>
    %40 = vector.broadcast %39 : vector<1x1xf32> to vector<1x32xf32>
    %41 = arith.mulf %29, %40 : vector<1x32xf32>
    %42 = arith.mulf %41, %31 : vector<1x32xf32>
    %43 = arith.truncf %42 : vector<1x32xf32> to vector<1x32xbf16>
    %c0_24 = arith.constant 0 : index
    %c0_25 = arith.constant 0 : index
    %c0_26 = arith.constant 0 : index
    %44 = vector.load %arg10[%c0_24, %c0_25, %c0_26] : memref<1x32x32xbf16, #tpu.memory_space<vmem>>, vector<1x32x32xbf16>
    %45 = vector.shape_cast %44 : vector<1x32x32xbf16> to vector<32x32xbf16>
    %cst_27 = arith.constant dense<0.000000e+00> : vector<1x32xf32>
    %46 = tpu.matmul %43, %45, %cst_27 {dimension_numbers = #tpu.dot_dimension_numbers<[1], [0], [0], [1], [0, 0, 1, 1], [], []>} : vector<1x32xbf16>, vector<32x32xbf16>, vector<1x32xf32> -> vector<1x32xf32>
    %c0_28 = arith.constant 0 : index
    %c0_29 = arith.constant 0 : index
    %c0_30 = arith.constant 0 : index
    %47 = vector.load %arg11[%c0_28, %c0_29, %c0_30] : memref<1x32x64xbf16, #tpu.memory_space<vmem>>, vector<1x32x64xbf16>
    %48 = vector.shape_cast %47 : vector<1x32x64xbf16> to vector<32x64xbf16>
    %cst_31 = arith.constant dense<0.000000e+00> : vector<8x64xf32>
    %49 = tpu.matmul %6, %48, %cst_31 {dimension_numbers = #tpu.dot_dimension_numbers<[1], [0], [0], [1], [0, 0, 1, 1], [], []>} : vector<8x32xbf16>, vector<32x64xbf16>, vector<8x64xf32> -> vector<8x64xf32>
    %50 = vector.extract_strided_slice %49 {offsets = [0, 0], sizes = [8, 32], strides = [1, 1]} : vector<8x64xf32> to vector<8x32xf32>
    %51 = vector.extract_strided_slice %49 {offsets = [0, 32], sizes = [8, 32], strides = [1, 1]} : vector<8x64xf32> to vector<8x32xf32>
    %c0_32 = arith.constant 0 : index
    %c0_33 = arith.constant 0 : index
    %c0_34 = arith.constant 0 : index
    %52 = vector.load %arg5[%c0_32, %c0_33, %c0_34] : memref<1x1x8xf32, #tpu.memory_space<vmem>>, vector<1x1x8xf32>
    %53 = vector.shape_cast %52 : vector<1x1x8xf32> to vector<1x8xf32>
    %54 = vector.extract_strided_slice %46 {offsets = [0, 0], sizes = [1, 8], strides = [1, 1]} : vector<1x32xf32> to vector<1x8xf32>
    %55 = arith.truncf %54 : vector<1x8xf32> to vector<1x8xbf16>
    %56 = vector.extract_strided_slice %50 {offsets = [0, 0], sizes = [8, 8], strides = [1, 1]} : vector<8x32xf32> to vector<8x8xf32>
    %57 = arith.truncf %56 : vector<8x8xf32> to vector<8x8xbf16>
    %cst_35 = arith.constant dense<0.000000e+00> : vector<1x8xf32>
    %58 = tpu.matmul %55, %57, %cst_35 {dimension_numbers = #tpu.dot_dimension_numbers<[1], [1], [0], [0], [0, 0, 1, 0], [], []>} : vector<1x8xbf16>, vector<8x8xbf16>, vector<1x8xf32> -> vector<1x8xf32>
    %59 = arith.addf %58, %53 : vector<1x8xf32>
    %cst_36 = arith.constant dense<0xFF800000> : vector<1xf32>
    %60 = vector.multi_reduction <maximumf>, %59, %cst_36 [1] : vector<1x8xf32> to vector<1xf32>
    %61 = vector.shape_cast %60 : vector<1xf32> to vector<1x1xf32>
    %62 = vector.broadcast %61 : vector<1x1xf32> to vector<1x8xf32>
    %63 = arith.subf %59, %62 : vector<1x8xf32>
    %64 = math.exp %63 : vector<1x8xf32>
    %cst_37 = arith.constant dense<0.000000e+00> : vector<1xf32>
    %65 = vector.multi_reduction <add>, %64, %cst_37 [1] : vector<1x8xf32> to vector<1xf32>
    %66 = vector.shape_cast %65 : vector<1xf32> to vector<1x1xf32>
    %67 = tpu.reciprocal %66 {approx = true} : vector<1x1xf32> -> vector<1x1xf32>
    %68 = vector.broadcast %67 : vector<1x1xf32> to vector<1x8xf32>
    %69 = arith.mulf %64, %68 : vector<1x8xf32>
    %70 = arith.truncf %69 : vector<1x8xf32> to vector<1x8xbf16>
    %71 = vector.extract_strided_slice %51 {offsets = [0, 0], sizes = [8, 8], strides = [1, 1]} : vector<8x32xf32> to vector<8x8xf32>
    %72 = arith.truncf %71 : vector<8x8xf32> to vector<8x8xbf16>
    %cst_38 = arith.constant dense<0.000000e+00> : vector<1x8xf32>
    %73 = tpu.matmul %70, %72, %cst_38 {dimension_numbers = #tpu.dot_dimension_numbers<[1], [0], [0], [1], [0, 0, 1, 1], [], []>} : vector<1x8xbf16>, vector<8x8xbf16>, vector<1x8xf32> -> vector<1x8xf32>
    %c0_39 = arith.constant 0 : index
    %c0_40 = arith.constant 0 : index
    %74 = vector.load %arg20[%c0_39, %c0_40] : memref<1x32xf32, #tpu.memory_space<vmem>>, vector<1x8xf32>
    tpu.vector_store %arg20[%c0_39, %c0_40], %73 {strides = array<i32>} : memref<1x32xf32, #tpu.memory_space<vmem>>, vector<1x8xf32>,
    %75 = vector.extract_strided_slice %46 {offsets = [0, 8], sizes = [1, 8], strides = [1, 1]} : vector<1x32xf32> to vector<1x8xf32>
    %76 = arith.truncf %75 : vector<1x8xf32> to vector<1x8xbf16>
    %77 = vector.extract_strided_slice %50 {offsets = [0, 8], sizes = [8, 8], strides = [1, 1]} : vector<8x32xf32> to vector<8x8xf32>
    %78 = arith.truncf %77 : vector<8x8xf32> to vector<8x8xbf16>
    %cst_41 = arith.constant dense<0.000000e+00> : vector<1x8xf32>
    %79 = tpu.matmul %76, %78, %cst_41 {dimension_numbers = #tpu.dot_dimension_numbers<[1], [1], [0], [0], [0, 0, 1, 0], [], []>} : vector<1x8xbf16>, vector<8x8xbf16>, vector<1x8xf32> -> vector<1x8xf32>
    %80 = arith.addf %79, %53 : vector<1x8xf32>
    %cst_42 = arith.constant dense<0xFF800000> : vector<1xf32>
    %81 = vector.multi_reduction <maximumf>, %80, %cst_42 [1] : vector<1x8xf32> to vector<1xf32>
    %82 = vector.shape_cast %81 : vector<1xf32> to vector<1x1xf32>
    %83 = vector.broadcast %82 : vector<1x1xf32> to vector<1x8xf32>
    %84 = arith.subf %80, %83 : vector<1x8xf32>
    %85 = math.exp %84 : vector<1x8xf32>
    %cst_43 = arith.constant dense<0.000000e+00> : vector<1xf32>
    %86 = vector.multi_reduction <add>, %85, %cst_43 [1] : vector<1x8xf32> to vector<1xf32>
    %87 = vector.shape_cast %86 : vector<1xf32> to vector<1x1xf32>
    %88 = tpu.reciprocal %87 {approx = true} : vector<1x1xf32> -> vector<1x1xf32>
    %89 = vector.broadcast %88 : vector<1x1xf32> to vector<1x8xf32>
    %90 = arith.mulf %85, %89 : vector<1x8xf32>
    %91 = arith.truncf %90 : vector<1x8xf32> to vector<1x8xbf16>
    %92 = vector.extract_strided_slice %51 {offsets = [0, 8], sizes = [8, 8], strides = [1, 1]} : vector<8x32xf32> to vector<8x8xf32>
    %93 = arith.truncf %92 : vector<8x8xf32> to vector<8x8xbf16>
    %cst_44 = arith.constant dense<0.000000e+00> : vector<1x8xf32>
    %94 = tpu.matmul %91, %93, %cst_44 {dimension_numbers = #tpu.dot_dimension_numbers<[1], [0], [0], [1], [0, 0, 1, 1], [], []>} : vector<1x8xbf16>, vector<8x8xbf16>, vector<1x8xf32> -> vector<1x8xf32>
    %c0_45 = arith.constant 0 : index
    %c8 = arith.constant 8 : index
    %95 = vector.load %arg20[%c0_45, %c8] : memref<1x32xf32, #tpu.memory_space<vmem>>, vector<1x8xf32>
    tpu.vector_store %arg20[%c0_45, %c8], %94 {strides = array<i32>} : memref<1x32xf32, #tpu.memory_space<vmem>>, vector<1x8xf32>,
    %96 = vector.extract_strided_slice %46 {offsets = [0, 16], sizes = [1, 8], strides = [1, 1]} : vector<1x32xf32> to vector<1x8xf32>
    %97 = arith.truncf %96 : vector<1x8xf32> to vector<1x8xbf16>
    %98 = vector.extract_strided_slice %50 {offsets = [0, 16], sizes = [8, 8], strides = [1, 1]} : vector<8x32xf32> to vector<8x8xf32>
    %99 = arith.truncf %98 : vector<8x8xf32> to vector<8x8xbf16>
    %cst_46 = arith.constant dense<0.000000e+00> : vector<1x8xf32>
    %100 = tpu.matmul %97, %99, %cst_46 {dimension_numbers = #tpu.dot_dimension_numbers<[1], [1], [0], [0], [0, 0, 1, 0], [], []>} : vector<1x8xbf16>, vector<8x8xbf16>, vector<1x8xf32> -> vector<1x8xf32>
    %101 = arith.addf %100, %53 : vector<1x8xf32>
    %cst_47 = arith.constant dense<0xFF800000> : vector<1xf32>
    %102 = vector.multi_reduction <maximumf>, %101, %cst_47 [1] : vector<1x8xf32> to vector<1xf32>
    %103 = vector.shape_cast %102 : vector<1xf32> to vector<1x1xf32>
    %104 = vector.broadcast %103 : vector<1x1xf32> to vector<1x8xf32>
    %105 = arith.subf %101, %104 : vector<1x8xf32>
    %106 = math.exp %105 : vector<1x8xf32>
    %cst_48 = arith.constant dense<0.000000e+00> : vector<1xf32>
    %107 = vector.multi_reduction <add>, %106, %cst_48 [1] : vector<1x8xf32> to vector<1xf32>
    %108 = vector.shape_cast %107 : vector<1xf32> to vector<1x1xf32>
    %109 = tpu.reciprocal %108 {approx = true} : vector<1x1xf32> -> vector<1x1xf32>
    %110 = vector.broadcast %109 : vector<1x1xf32> to vector<1x8xf32>
    %111 = arith.mulf %106, %110 : vector<1x8xf32>
    %112 = arith.truncf %111 : vector<1x8xf32> to vector<1x8xbf16>
    %113 = vector.extract_strided_slice %51 {offsets = [0, 16], sizes = [8, 8], strides = [1, 1]} : vector<8x32xf32> to vector<8x8xf32>
    %114 = arith.truncf %113 : vector<8x8xf32> to vector<8x8xbf16>
    %cst_49 = arith.constant dense<0.000000e+00> : vector<1x8xf32>
    %115 = tpu.matmul %112, %114, %cst_49 {dimension_numbers = #tpu.dot_dimension_numbers<[1], [0], [0], [1], [0, 0, 1, 1], [], []>} : vector<1x8xbf16>, vector<8x8xbf16>, vector<1x8xf32> -> vector<1x8xf32>
    %c0_50 = arith.constant 0 : index
    %c16 = arith.constant 16 : index
    %116 = vector.load %arg20[%c0_50, %c16] : memref<1x32xf32, #tpu.memory_space<vmem>>, vector<1x8xf32>
    tpu.vector_store %arg20[%c0_50, %c16], %115 {strides = array<i32>} : memref<1x32xf32, #tpu.memory_space<vmem>>, vector<1x8xf32>,
    %117 = vector.extract_strided_slice %46 {offsets = [0, 24], sizes = [1, 8], strides = [1, 1]} : vector<1x32xf32> to vector<1x8xf32>
    %118 = arith.truncf %117 : vector<1x8xf32> to vector<1x8xbf16>
    %119 = vector.extract_strided_slice %50 {offsets = [0, 24], sizes = [8, 8], strides = [1, 1]} : vector<8x32xf32> to vector<8x8xf32>
    %120 = arith.truncf %119 : vector<8x8xf32> to vector<8x8xbf16>
    %cst_51 = arith.constant dense<0.000000e+00> : vector<1x8xf32>
    %121 = tpu.matmul %118, %120, %cst_51 {dimension_numbers = #tpu.dot_dimension_numbers<[1], [1], [0], [0], [0, 0, 1, 0], [], []>} : vector<1x8xbf16>, vector<8x8xbf16>, vector<1x8xf32> -> vector<1x8xf32>
    %122 = arith.addf %121, %53 : vector<1x8xf32>
    %cst_52 = arith.constant dense<0xFF800000> : vector<1xf32>
    %123 = vector.multi_reduction <maximumf>, %122, %cst_52 [1] : vector<1x8xf32> to vector<1xf32>
    %124 = vector.shape_cast %123 : vector<1xf32> to vector<1x1xf32>
    %125 = vector.broadcast %124 : vector<1x1xf32> to vector<1x8xf32>
    %126 = arith.subf %122, %125 : vector<1x8xf32>
    %127 = math.exp %126 : vector<1x8xf32>
    %cst_53 = arith.constant dense<0.000000e+00> : vector<1xf32>
    %128 = vector.multi_reduction <add>, %127, %cst_53 [1] : vector<1x8xf32> to vector<1xf32>
    %129 = vector.shape_cast %128 : vector<1xf32> to vector<1x1xf32>
    %130 = tpu.reciprocal %129 {approx = true} : vector<1x1xf32> -> vector<1x1xf32>
    %131 = vector.broadcast %130 : vector<1x1xf32> to vector<1x8xf32>
    %132 = arith.mulf %127, %131 : vector<1x8xf32>
    %133 = arith.truncf %132 : vector<1x8xf32> to vector<1x8xbf16>
    %134 = vector.extract_strided_slice %51 {offsets = [0, 24], sizes = [8, 8], strides = [1, 1]} : vector<8x32xf32> to vector<8x8xf32>
    %135 = arith.truncf %134 : vector<8x8xf32> to vector<8x8xbf16>
    %cst_54 = arith.constant dense<0.000000e+00> : vector<1x8xf32>
    %136 = tpu.matmul %133, %135, %cst_54 {dimension_numbers = #tpu.dot_dimension_numbers<[1], [0], [0], [1], [0, 0, 1, 1], [], []>} : vector<1x8xbf16>, vector<8x8xbf16>, vector<1x8xf32> -> vector<1x8xf32>
    %c0_55 = arith.constant 0 : index
    %c24 = arith.constant 24 : index
    %137 = vector.load %arg20[%c0_55, %c24] : memref<1x32xf32, #tpu.memory_space<vmem>>, vector<1x8xf32>
    tpu.vector_store %arg20[%c0_55, %c24], %136 {strides = array<i32>} : memref<1x32xf32, #tpu.memory_space<vmem>>, vector<1x8xf32>,
    %c0_56 = arith.constant 0 : index
    %c0_57 = arith.constant 0 : index
    %138 = vector.load %arg20[%c0_56, %c0_57] : memref<1x32xf32, #tpu.memory_space<vmem>>, vector<1x32xf32>
    %139 = arith.truncf %138 : vector<1x32xf32> to vector<1x32xbf16>
    %c0_58 = arith.constant 0 : index
    %c0_59 = arith.constant 0 : index
    %c0_60 = arith.constant 0 : index
    %140 = vector.load %arg12[%c0_58, %c0_59, %c0_60] : memref<1x32x32xbf16, #tpu.memory_space<vmem>>, vector<1x32x32xbf16>
    %141 = vector.shape_cast %140 : vector<1x32x32xbf16> to vector<32x32xbf16>
    %cst_61 = arith.constant dense<0.000000e+00> : vector<1x32xf32>
    %142 = tpu.matmul %139, %141, %cst_61 {dimension_numbers = #tpu.dot_dimension_numbers<[1], [0], [0], [1], [0, 0, 1, 1], [], []>} : vector<1x32xbf16>, vector<32x32xbf16>, vector<1x32xf32> -> vector<1x32xf32>
    %143 = arith.addf %29, %142 : vector<1x32xf32>
    %c0_62 = arith.constant 0 : index
    %c0_63 = arith.constant 0 : index
    %c0_64 = arith.constant 0 : index
    %144 = vector.load %arg13[%c0_62, %c0_63, %c0_64] : memref<1x1x32xf32, #tpu.memory_space<vmem>>, vector<1x1x32xf32>
    %145 = vector.shape_cast %144 : vector<1x1x32xf32> to vector<1x32xf32>
    %146 = arith.mulf %143, %143 : vector<1x32xf32>
    %cst_65 = arith.constant dense<0.000000e+00> : vector<1xf32>
    %147 = vector.multi_reduction <add>, %146, %cst_65 [1] : vector<1x32xf32> to vector<1xf32>
    %148 = vector.shape_cast %147 : vector<1xf32> to vector<1x1xf32>
    %cst_66 = arith.constant 3.200000e+01 : f32
    %149 = vector.broadcast %cst_66 : f32 to vector<1x1xf32>
    %150 = arith.divf %148, %149 : vector<1x1xf32>
    %cst_67 = arith.constant 9.99999997E-7 : f32
    %151 = vector.broadcast %cst_67 : f32 to vector<1x1xf32>
    %152 = arith.addf %150, %151 : vector<1x1xf32>
    %153 = math.rsqrt %152 : vector<1x1xf32>
    %154 = vector.broadcast %153 : vector<1x1xf32> to vector<1x32xf32>
    %155 = arith.mulf %143, %154 : vector<1x32xf32>
    %156 = arith.mulf %155, %145 : vector<1x32xf32>
    %157 = arith.truncf %156 : vector<1x32xf32> to vector<1x32xbf16>
    %c0_68 = arith.constant 0 : index
    %c0_69 = arith.constant 0 : index
    %c0_70 = arith.constant 0 : index
    %158 = vector.load %arg14[%c0_68, %c0_69, %c0_70] : memref<1x32x128xbf16, #tpu.memory_space<vmem>>, vector<1x32x128xbf16>
    %159 = vector.shape_cast %158 : vector<1x32x128xbf16> to vector<32x128xbf16>
    %cst_71 = arith.constant dense<0.000000e+00> : vector<1x128xf32>
    %160 = tpu.matmul %157, %159, %cst_71 {dimension_numbers = #tpu.dot_dimension_numbers<[1], [0], [0], [1], [0, 0, 1, 1], [], []>} : vector<1x32xbf16>, vector<32x128xbf16>, vector<1x128xf32> -> vector<1x128xf32>
    %161 = vector.extract_strided_slice %160 {offsets = [0, 0], sizes = [1, 64], strides = [1, 1]} : vector<1x128xf32> to vector<1x64xf32>
    %cst_72 = arith.constant 5.000000e-01 : f32
    %162 = vector.broadcast %cst_72 : f32 to vector<1x64xf32>
    %163 = arith.mulf %162, %161 : vector<1x64xf32>
    %cst_73 = arith.constant 4.471500e-02 : f32
    %164 = vector.broadcast %cst_73 : f32 to vector<1x64xf32>
    %165 = arith.mulf %164, %161 : vector<1x64xf32>
    %166 = arith.mulf %165, %161 : vector<1x64xf32>
    %167 = arith.mulf %166, %161 : vector<1x64xf32>
    %168 = arith.addf %161, %167 : vector<1x64xf32>
    %cst_74 = arith.constant 0.797884583 : f32
    %169 = vector.broadcast %cst_74 : f32 to vector<1x64xf32>
    %170 = arith.mulf %169, %168 : vector<1x64xf32>
    %171 = math.tanh %170 : vector<1x64xf32>
    %cst_75 = arith.constant 1.000000e+00 : f32
    %172 = vector.broadcast %cst_75 : f32 to vector<1x64xf32>
    %173 = arith.addf %172, %171 : vector<1x64xf32>
    %174 = arith.mulf %163, %173 : vector<1x64xf32>
    %175 = vector.extract_strided_slice %160 {offsets = [0, 64], sizes = [1, 64], strides = [1, 1]} : vector<1x128xf32> to vector<1x64xf32>
    %176 = arith.mulf %174, %175 : vector<1x64xf32>
    %177 = arith.truncf %176 : vector<1x64xf32> to vector<1x64xbf16>
    %c0_76 = arith.constant 0 : index
    %c0_77 = arith.constant 0 : index
    %c0_78 = arith.constant 0 : index
    %178 = vector.load %arg15[%c0_76, %c0_77, %c0_78] : memref<1x64x32xbf16, #tpu.memory_space<vmem>>, vector<1x64x32xbf16>
    %179 = vector.shape_cast %178 : vector<1x64x32xbf16> to vector<64x32xbf16>
    %cst_79 = arith.constant dense<0.000000e+00> : vector<1x32xf32>
    %180 = tpu.matmul %177, %179, %cst_79 {dimension_numbers = #tpu.dot_dimension_numbers<[1], [0], [0], [1], [0, 0, 1, 1], [], []>} : vector<1x64xbf16>, vector<64x32xbf16>, vector<1x32xf32> -> vector<1x32xf32>
    %181 = arith.addf %143, %180 : vector<1x32xf32>
    %c0_80 = arith.constant 0 : index
    %c0_81 = arith.constant 0 : index
    %182 = vector.load %arg19[%c0_80, %c0_81] : memref<1x32xf32, #tpu.memory_space<vmem>>, vector<1x32xf32>
    tpu.vector_store %arg19[%c0_80, %c0_81], %181 {strides = array<i32>} : memref<1x32xf32, #tpu.memory_space<vmem>>, vector<1x32xf32>,
    %c1_i32 = arith.constant 1 : i32
    %183 = arith.cmpi eq, %arg1, %c1_i32 : i32
    %184 = arith.extui %183 : i1 to i32
    %c0_i32_82 = arith.constant 0 : i32
    %185 = arith.cmpi ne, %184, %c0_i32_82 : i32
    scf.if %185 {
      %c0_83 = arith.constant 0 : index
      %c0_84 = arith.constant 0 : index
      %186 = vector.load %arg16[%c0_83, %c0_84] : memref<1x32xf32, #tpu.memory_space<vmem>>, vector<1x32xf32>
      %187 = arith.mulf %181, %181 : vector<1x32xf32>
      %cst_85 = arith.constant dense<0.000000e+00> : vector<1xf32>
      %188 = vector.multi_reduction <add>, %187, %cst_85 [1] : vector<1x32xf32> to vector<1xf32>
      %189 = vector.shape_cast %188 : vector<1xf32> to vector<1x1xf32>
      %cst_86 = arith.constant 3.200000e+01 : f32
      %190 = vector.broadcast %cst_86 : f32 to vector<1x1xf32>
      %191 = arith.divf %189, %190 : vector<1x1xf32>
      %cst_87 = arith.constant 9.99999997E-7 : f32
      %192 = vector.broadcast %cst_87 : f32 to vector<1x1xf32>
      %193 = arith.addf %191, %192 : vector<1x1xf32>
      %194 = math.rsqrt %193 : vector<1x1xf32>
      %195 = vector.broadcast %194 : vector<1x1xf32> to vector<1x32xf32>
      %196 = arith.mulf %181, %195 : vector<1x32xf32>
      %197 = arith.mulf %196, %186 : vector<1x32xf32>
      %198 = arith.truncf %197 : vector<1x32xf32> to vector<1x32xbf16>
      %c0_88 = arith.constant 0 : index
      %c0_89 = arith.constant 0 : index
      %199 = vector.load %arg17[%c0_88, %c0_89] : memref<32x128xbf16, #tpu.memory_space<vmem>>, vector<32x128xbf16>
      %cst_90 = arith.constant dense<0.000000e+00> : vector<1x128xf32>
      %200 = tpu.matmul %198, %199, %cst_90 {dimension_numbers = #tpu.dot_dimension_numbers<[1], [0], [0], [1], [0, 0, 1, 1], [], []>} : vector<1x32xbf16>, vector<32x128xbf16>, vector<1x128xf32> -> vector<1x128xf32>
      %c0_91 = arith.constant 0 : index
      %c0_92 = arith.constant 0 : index
      %c0_93 = arith.constant 0 : index
      %201 = vector.load %arg18[%c0_91, %c0_92, %c0_93] : memref<1x1x128xf32, #tpu.memory_space<vmem>>, vector<1x1x128xf32>
      %202 = vector.shape_cast %201 : vector<1x1x128xf32> to vector<1x128xf32>
      %203 = vector.shape_cast %200 : vector<1x128xf32> to vector<1x1x128xf32>
      tpu.vector_store %arg18[%c0_91, %c0_92, %c0_93], %203 {strides = array<i32>} : memref<1x1x128xf32, #tpu.memory_space<vmem>>, vector<1x1x128xf32>,
    } else {
    }
    return
  }
  func.func @transform_0(%arg0: i32, %arg1: i32) -> (i32, i32, i32) {
    %c0_i32 = arith.constant 0 : i32
    %c0_i32_0 = arith.constant 0 : i32
    %c0_i32_1 = arith.constant 0 : i32
    return %arg0, %c0_i32, %c0_i32_0 : i32, i32, i32
  }
  func.func @transform_1(%arg0: i32, %arg1: i32) -> (i32, i32, i32) {
    %c0_i32 = arith.constant 0 : i32
    %c0_i32_0 = arith.constant 0 : i32
    %c0_i32_1 = arith.constant 0 : i32
    return %arg0, %c0_i32, %c0_i32_0 : i32, i32, i32
  }
  func.func @transform_2(%arg0: i32, %arg1: i32) -> (i32, i32, i32) {
    %c0_i32 = arith.constant 0 : i32
    %c0_i32_0 = arith.constant 0 : i32
    %c0_i32_1 = arith.constant 0 : i32
    %c0_i32_2 = arith.constant 0 : i32
    return %c0_i32, %c0_i32_0, %c0_i32_1 : i32, i32, i32
  }
  func.func @transform_3(%arg0: i32, %arg1: i32) -> (i32, i32, i32) {
    %c0_i32 = arith.constant 0 : i32
    %c0_i32_0 = arith.constant 0 : i32
    %c0_i32_1 = arith.constant 0 : i32
    return %arg0, %c0_i32, %c0_i32_0 : i32, i32, i32
  }
  func.func @transform_4(%arg0: i32, %arg1: i32) -> (i32, i32, i32) {
    %c0_i32 = arith.constant 0 : i32
    %c0_i32_0 = arith.constant 0 : i32
    %c0_i32_1 = arith.constant 0 : i32
    return %arg1, %c0_i32, %c0_i32_0 : i32, i32, i32
  }
  func.func @transform_5(%arg0: i32, %arg1: i32) -> (i32, i32, i32) {
    %c0_i32 = arith.constant 0 : i32
    %c0_i32_0 = arith.constant 0 : i32
    %c0_i32_1 = arith.constant 0 : i32
    return %arg1, %c0_i32, %c0_i32_0 : i32, i32, i32
  }
  func.func @transform_6(%arg0: i32, %arg1: i32) -> (i32, i32, i32) {
    %c0_i32 = arith.constant 0 : i32
    %c0_i32_0 = arith.constant 0 : i32
    %c0_i32_1 = arith.constant 0 : i32
    return %arg1, %c0_i32, %c0_i32_0 : i32, i32, i32
  }
  func.func @transform_7(%arg0: i32, %arg1: i32) -> (i32, i32, i32) {
    %c0_i32 = arith.constant 0 : i32
    %c0_i32_0 = arith.constant 0 : i32
    %c0_i32_1 = arith.constant 0 : i32
    return %arg1, %c0_i32, %c0_i32_0 : i32, i32, i32
  }
  func.func @transform_8(%arg0: i32, %arg1: i32) -> (i32, i32, i32) {
    %c0_i32 = arith.constant 0 : i32
    %c0_i32_0 = arith.constant 0 : i32
    %c0_i32_1 = arith.constant 0 : i32
    return %arg1, %c0_i32, %c0_i32_0 : i32, i32, i32
  }
  func.func @transform_9(%arg0: i32, %arg1: i32) -> (i32, i32, i32) {
    %c0_i32 = arith.constant 0 : i32
    %c0_i32_0 = arith.constant 0 : i32
    %c0_i32_1 = arith.constant 0 : i32
    return %arg1, %c0_i32, %c0_i32_0 : i32, i32, i32
  }
  func.func @transform_10(%arg0: i32, %arg1: i32) -> (i32, i32, i32) {
    %c0_i32 = arith.constant 0 : i32
    %c0_i32_0 = arith.constant 0 : i32
    %c0_i32_1 = arith.constant 0 : i32
    return %arg1, %c0_i32, %c0_i32_0 : i32, i32, i32
  }
  func.func @transform_11(%arg0: i32, %arg1: i32) -> (i32, i32, i32) {
    %c0_i32 = arith.constant 0 : i32
    %c0_i32_0 = arith.constant 0 : i32
    %c0_i32_1 = arith.constant 0 : i32
    return %arg1, %c0_i32, %c0_i32_0 : i32, i32, i32
  }
  func.func @transform_12(%arg0: i32, %arg1: i32) -> (i32, i32, i32) {
    %c0_i32 = arith.constant 0 : i32
    %c0_i32_0 = arith.constant 0 : i32
    %c0_i32_1 = arith.constant 0 : i32
    return %arg1, %c0_i32, %c0_i32_0 : i32, i32, i32
  }
  func.func @transform_13(%arg0: i32, %arg1: i32) -> (i32, i32, i32) {
    %c0_i32 = arith.constant 0 : i32
    %c0_i32_0 = arith.constant 0 : i32
    %c0_i32_1 = arith.constant 0 : i32
    return %arg1, %c0_i32, %c0_i32_0 : i32, i32, i32
  }
  func.func @transform_14(%arg0: i32, %arg1: i32) -> (i32, i32) {
    %c0_i32 = arith.constant 0 : i32
    %c0_i32_0 = arith.constant 0 : i32
    %c0_i32_1 = arith.constant 0 : i32
    return %c0_i32, %c0_i32_0 : i32, i32
  }
  func.func @transform_15(%arg0: i32, %arg1: i32) -> (i32, i32) {
    %c0_i32 = arith.constant 0 : i32
    %c0_i32_0 = arith.constant 0 : i32
    %c0_i32_1 = arith.constant 0 : i32
    return %c0_i32, %c0_i32_0 : i32, i32
  }
  func.func @transform_16(%arg0: i32, %arg1: i32) -> (i32, i32, i32) {
    %c0_i32 = arith.constant 0 : i32
    %c0_i32_0 = arith.constant 0 : i32
    %c0_i32_1 = arith.constant 0 : i32
    return %arg0, %c0_i32, %c0_i32_0 : i32, i32, i32
  }
}

</mosaic_0001>

<bundles_post_ra>
// kernel: _lambda_.2
= control target key start
LH: loop header
LB: loop body
LE: loop exit
PB: predicated region body
PF: predicated region fallthrough
CT: control target
= control target key end

     0   :  { %s1781_s30 = smov 0   ;;  %s1783_s10 = smov 0   ;;  %s1998_s0 = inlined_call_operand.vmem [shape: f32[2,8,32], index: 0, kind: input, shape index: {}]   ;;  %s1999_s1 = inlined_call_operand.vmem [shape: f32[2,4,8,8], index: 1, kind: input, shape index: {}]   ;;  %s2000_s2 = inlined_call_operand.vmem [shape: f32[2,1,32], index: 2, kind: input, shape index: {}]   ;;  %s2001_s3 = inlined_call_operand.vmem [shape: bf16[2,32,96], index: 3, kind: input, shape index: {}]   ;;  %s2002_s4 = inlined_call_operand.vmem [shape: bf16[2,32,32], index: 4, kind: input, shape index: {}]   ;;  %s2003_s5 = inlined_call_operand.vmem [shape: f32[2,1,32], index: 5, kind: input, shape index: {}]   ;;  %s2004_s6 = inlined_call_operand.vmem [shape: bf16[2,32,128], index: 6, kind: input, shape index: {}]   ;;  %s2005_s7 = inlined_call_operand.vmem [shape: bf16[2,64,32], index: 7, kind: input, shape index: {}]   ;;  %s2006_s8 = inlined_call_operand.vmem [shape: f32[1,32], index: 8, kind: input, shape index: {}]   ;;  %s2007_s9 = inlined_call_operand.vmem [shape: f32[2,8,32], index: 9, kind: output, shape index: {}]  }
   0x1   :  { %2010 = sst [smem:[#allocation8_spill]] %s1998_s0  ;;  %s1785_s11 = smov 0  }
   0x2   :  { %2011 = sst [smem:[#allocation9_spill]] %s1999_s1  ;;  %s1787_s12 = smov 0  }
   0x3   :  { %s1789_s13 = smov 0  }
   0x4 LB: > { %2012 = sst [smem:[#allocation4_spill]] %s1705_s11  ;;  %s28_s14 = sadd.s32 1, %s1705_s11  ;;  %s1713_s13 = sphi %s1789_s13, %s19_s13   ;;  %s1709_s12 = sphi %s1787_s12, %s2022_s12   ;;  %s1705_s11 = sphi %s1785_s11, %s2021_s11   ;;  %s1701_s10 = sphi %s1783_s10, %s2020_s10   ;;  %s1697_s30 = sphi %s1781_s30, %s2019_s30  }
   0x5   : > { %2013 = sst [smem:[#allocation5_spill]] %s1709_s12  ;;  %s31_s15 = sadd.s32 1, %s1709_s12 }
   0x6   : > { %p29_p0 = scmp.ge.s32.totalorder %s28_s14, 2  ;;  %p1421_p1 = scmp.ge.s32.totalorder %s1713_s13, 1 }
   0x7   : > { %p364_p2 = scmp.lt.s32.totalorder %s1713_s13, 5 }
   0x8   : > { %s2024_s14 = smov (%p29_p0, %s28_s14), 0  ;;  %s2026_s15 = smov (!%p29_p0, %s31_s15), %s1709_s12 }
   0x9   : > { %2014 = sst [smem:[#allocation6_spill]] %s2024_s14  ;;  %p365_p3 = pnand %p1421_p1, %p364_p2 }
   0xa   : > { %p33_p4 = scmp.ge.s32.totalorder %s2026_s15, 2  ;;  %p429_p5 = scmp.lt.s32.totalorder (!%p365_p3), %s1701_s10, 1 }
   0xb   : > { %368 = sbr.rel (%p365_p3) target bundleno = 2444 (0x98c), region = 56  ;;  %p438_p6 = scmp.lt.s32.totalorder (!%p365_p3), %s1697_s30, 1 }
   0xc   : > { %s2028_s15 = smov (%p33_p4, %s2026_s15), 0  ;;  %s2016_s0 = sld [smem:[#allocation8_spill]] (!%p365_p3) }
   0xd   : > { %2015 = sst [smem:[#allocation7_spill]] %s2028_s15  ;;  %p1434_p7 = scmp.ne.s32.totalorder (!%p365_p3), %s1697_s30, 0 }
   0xe   : > { %s2017_s1 = sld [smem:[#allocation9_spill]] (!%p365_p3) }
  0x10   : > { %s2030_s10 = smov (!%p429_p5, %s1701_s10), 1 }
  0x11   : > { %s1815_s16 = scalar_select %p438_p6, %s1697_s30, 1 }
  0x12   : > { %s1422_s17 = sshll.u32 %s2030_s10, 3  ;;  %s1466_s18 = sshll.u32 %s2030_s10, 5 }
  0x13   : > { %s432_s21 = scalar_lea.vmem %s2016_s0, %s1422_s17  ;;  %s1467_s28 = sshll.u32 %s1815_s16, 4 }
  0x14   : > { %s1823_s24 = scalar_lea.vmem %s2017_s1, %s1466_s18  ;;  %s445_s14 = scalar_lea.vmem %s2001_s3, %s1467_s28 }
  0x15   : > { %s1836_s11 = scalar_lea.vmem %s2002_s4, %s1467_s28  ;;  %s453_s22 = scalar_lea.vmem %s2003_s5, %s1815_s16 }
  0x16   : > { %s1845_s0 = scalar_lea.vmem %s2004_s6, %s1467_s28  ;;  %s1470_s25 = sshll.u32 %s1815_s16, 5 }
  0x17   : > { %s1851_s15 = scalar_lea.vmem %s2007_s9, %s1422_s17  ;;  %s1856_s12 = scalar_lea.vmem %s2005_s7, %s1470_s25 }
  0x18   : > { %472 = sbr.rel (%p1434_p7) target bundleno = 31 (0x1f), region = 60 }
  0x1d   : > { %v473_v0 = vld [vmem:[%s432_s21] sm:$0xff]  ;;  %vm474_vm0 = vcmask 261120  }
  0x1e   : > { %475 = vst.msk [vmem:[#allocation2] sm:$0xff] %vm474_vm0, %v473_v0 }
  0x1f PF: > { %vm479_vm1 = vcmask 261120   ;;  %v1641_v4 = vld [vmem:[%s445_s14 + $0x8] sm:$0xff]   ;;  %v1715_v5 = vmov 0.0   ;;  %vm1716_vm2 = vmmov 0   ;;  %v1642_v6 = vld [vmem:[%s445_s14] sm:$0xff]   ;;  %s2018_s21 = scalar_lea.vmem %s2000_s2, %s1815_s16  ;;  %s1717_s14 = smov 88  }
  0x20   : > { %1501 = vmatprep.subr.bf16.mxu0 %v1715_v5  ;;  %1505 = vmatprep.mubr.msk.bf16.mxu0 %vm1716_vm2, %v1715_v5  ;;  %v1435_v11 = vld [vmem:[%s2018_s21] ss:$0 sm:$0xff]  ;;  %s1718_s27 = smov 96   ;;  %s1719_s28 = smov 120   ;;  %vm560_vm3 = vcmask 64512   ;;  %v1441_v38 = vld [vmem:[%s1823_s24 + $0x8] sm:$0xff] }
  0x21   : > { %1502 = vmatpush3.bf16.msra.mxu0 %v1641_v4  ;;  %1509 = vmatprep.subr.bf16.mxu1 %v1715_v5  ;;  %s1720_s10 = smov 80   ;;  %s1721_s19 = smov 112   ;;  %v556_v31 = vld [vmem:[%s1823_s24] sm:$0xff]  ;;  %v1444_v45 = vld [vmem:[%s1823_s24 + $0x10] sm:$0xff]  ;;  %v1447_v52 = vld [vmem:[%s1823_s24 + $0x18] sm:$0xff]  ;;  %vm624_vm4 = vcmask 1043456  }
  0x22   : > { %1503 = vmatprep.subr.bf16.mxu0 %v1715_v5  ;;  %1511 = vmatprep.mubr.msk.bf16.mxu1 %vm1716_vm2, %v1715_v5  ;;  %s1722_s20 = smov 72   ;;  %s1723_s18 = smov 104   ;;  %vm785_vm5 = vcmask 130112   ;;  %vm903_vm6 = vcmask 195712   ;;  %vm1021_vm7 = vcmask 261312   ;;  %vm1208_vm8 = vcmask 523264  }
  0x23   : > { %s1724_s24 = smov 56   ;;  %s1725_s23 = smov 64  }
  0x24   : > { %s1726_s25 = smov 40   ;;  %s1727_s26 = smov 48  }
  0x25   : > { %v1859_v1 = vld [vmem:[#allocation2] sm:$0xff]  ;;  %1504 = vmatpush3.bf16.msra.mxu0 %v1642_v6  ;;  %s1728_s29 = smov 8   ;;  %s1729_s1 = smov 16  }
  0x26   : > { %v478_v2 = vmul.f32 %v1859_v1, %v1859_v1  ;;  %1515 = vmatprep.subr.bf16.mxu0 %v1715_v5  ;;  %s1730_s17 = smov 24   ;;  %p1462_p8 = scmp.ne.s32.totalorder %s1697_s30, 1 }
  0x28   : > { %v480_v3 = vsel %vm479_vm1, %v478_v2, 0.0 }
  0x29   : > { %481 = vadd.xlane.f32.xlu0 %v480_v3 }
  0xb2   : > { %v482_v7 = vpop.xlane.xlu0 %481 }
  0xb3   : > { %v484_v8 = vmul.f32 0.03125, %v482_v7 }
  0xb5   : > { %v485_v9 = vadd.f32 1e-06, %v484_v8 }
  0xb7   : > { %1651 = vrsqrt.f32 %v485_v9 }
  0xc4   : > { %v1652_v10 = vpop.eup %1651 }
  0xc5   : > { %v487_v12 = vmul.f32 %v1652_v10, %v1859_v1 }
  0xc7   : > { %v494_v13 = vmul.f32 %v1435_v11, %v487_v12 }
  0xc9   : > { %v495_v14 = vpack.c.bf16 %v494_v13, %v494_v13 }
  0xcb   : > { %1506 = vmatmul.mubr.msk.bf16.vlgmr.msra.gmra.mxu0 %vm479_vm1, %v495_v14 }
  0xcc   : > { %1517 = vmatprep.mubr.msk.bf16.mxu0 %vm1716_vm2, %v1715_v5 }
 0x18b   : > { %v549_v15 = vpop.f32.mrf.mxu0 }
 0x18c   : > { %v1881_v16 = vpack.c.bf16 %v549_v15, %v549_v15 }
 0x18d   : > { %v1507_v17 = vpop.f32.mrf.mxu0 }
 0x18e   : > { %673 = vrot.lane.b32.xlu1 %v1881_v16, %s1717_s14  ;;  %558 = vrot.lane.b32.xlu0 %v1881_v16, %s1718_s27 }
 0x18f   : > { %v552_v18 = vpop.f32.mrf.mxu0 }
 0x191   : > { %v1508_v19 = vpop.f32.mrf.mxu0 }
 0x192   : > { %671 = vrot.lane.b32.xlu1 %v1881_v16, %s1719_s28 }
 0x196   : > { %791 = vrot.lane.b32.xlu1 %v1881_v16, %s1720_s10 }
 0x19a   : > { %789 = vrot.lane.b32.xlu1 %v1881_v16, %s1721_s19 }
 0x19e   : > { %909 = vrot.lane.b32.xlu1 %v1881_v16, %s1722_s20 }
 0x1a2   : > { %907 = vrot.lane.b32.xlu1 %v1881_v16, %s1723_s18 }
 0x200   : > { %v674_v20 = vpop.permute.xlu1 %673  ;;  %v559_v21 = vpop.permute.xlu0 %558 }
 0x201   : > { %v565_v22 = vsel %vm560_vm3, %v559_v21, 0  ;;  %v679_v24 = vsel %vm560_vm3, %v674_v20, 0 }
 0x202   : > { %1510 = vmatpush3.bf16.xpose.msra.mxu1 %v565_v22 }
 0x203   : > { %1521 = vmatprep.subr.bf16.mxu1 %v1715_v5 }
 0x204   : > { %v672_v23 = vpop.permute.xlu1 %671 }
 0x208   : > { %v792_v25 = vpop.permute.xlu1 %791 }
 0x209   : > { %1512 = vmatmul.mubr.msk.bf16.vlgmr.msra.gmra.mxu1 %vm560_vm3, %v1881_v16  ;;  %v797_v27 = vsel %vm560_vm3, %v792_v25, 0 }
 0x20a   : > { %1522 = vmatpush3.bf16.xpose.msra.mxu1 %v679_v24  ;;  %1523 = vmatprep.mubr.msk.bf16.mxu1 %vm1716_vm2, %v1715_v5 }
 0x20b   : > { %1533 = vmatprep.subr.bf16.mxu1 %v1715_v5 }
 0x20c   : > { %v790_v26 = vpop.permute.xlu1 %789 }
 0x210   : > { %v910_v28 = vpop.permute.xlu1 %909 }
 0x211   : > { %1524 = vmatmul.mubr.msk.bf16.vlgmr.msra.gmra.mxu1 %vm560_vm3, %v672_v23  ;;  %v915_v29 = vsel %vm560_vm3, %v910_v28, 0 }
 0x212   : > { %1534 = vmatpush3.bf16.xpose.msra.mxu1 %v797_v27  ;;  %1535 = vmatprep.mubr.msk.bf16.mxu1 %vm1716_vm2, %v1715_v5 }
 0x213   : > { %1545 = vmatprep.subr.bf16.mxu1 %v1715_v5 }
 0x214   : > { %v908_v30 = vpop.permute.xlu1 %907 }
 0x219   : > { %1536 = vmatmul.mubr.msk.bf16.vlgmr.msra.gmra.mxu1 %vm560_vm3, %v790_v26 }
 0x21a   : > { %1546 = vmatpush3.bf16.xpose.msra.mxu1 %v915_v29  ;;  %1547 = vmatprep.mubr.msk.bf16.mxu1 %vm1716_vm2, %v1715_v5 }
 0x21b   : > { %1557 = vmatprep.subr.bf16.mxu1 %v1715_v5 }
 0x221   : > { %1548 = vmatmul.mubr.msk.bf16.vlgmr.msra.gmra.mxu1 %vm560_vm3, %v908_v30 }
 0x222   : > { %1561 = vmatprep.mubr.msk.bf16.mxu1 %vm1716_vm2, %v1715_v5 }
 0x2c9   : > { %v601_v32 = vpop.f32.mrf.mxu1 }
 0x2ca   : > { %v602_v33 = vadd.f32 %v601_v32, %v556_v31 }
 0x2cb   : > { %v1513_v34 = vpop.f32.mrf.mxu1 }
 0x2cc   : > { %v607_v35 = vsel %vm560_vm3, %v602_v33, -inf }
 0x2cd   : > { %608 = vmax.xlane.f32.xlu1 %v607_v35  ;;  %v604_v36 = vpop.f32.mrf.mxu1 }
 0x2cf   : > { %v1514_v37 = vpop.f32.mrf.mxu1 }
 0x2d1   : > { %v715_v39 = vpop.f32.mrf.mxu1 }
 0x2d2   : > { %v716_v40 = vadd.f32 %v1441_v38, %v715_v39 }
 0x2d3   : > { %v1525_v41 = vpop.f32.mrf.mxu1 }
 0x2d4   : > { %v721_v42 = vsel %vm560_vm3, %v716_v40, -inf }
 0x2d5   : > { %722 = vmax.xlane.f32.xlu0 %v721_v42  ;;  %v718_v43 = vpop.f32.mrf.mxu1 }
 0x2d7   : > { %v1526_v44 = vpop.f32.mrf.mxu1 }
 0x2d9   : > { %v833_v46 = vpop.f32.mrf.mxu1 }
 0x2da   : > { %v834_v47 = vadd.f32 %v1444_v45, %v833_v46 }
 0x2db   : > { %v1537_v48 = vpop.f32.mrf.mxu1 }
 0x2dc   : > { %v839_v49 = vsel %vm560_vm3, %v834_v47, -inf }
 0x2dd   : > { %840 = vmax.xlane.f32.xlu0 %v839_v49  ;;  %v836_v50 = vpop.f32.mrf.mxu1  ;;  %v1643_v49 = vld [vmem:[%s1836_s11 + $0x8] sm:$0xff]  }
 0x2de   : > { %1558 = vmatpush3.bf16.msra.mxu1 %v1643_v49 }
 0x2df   : > { %v1538_v51 = vpop.f32.mrf.mxu1  ;;  %1559 = vmatprep.subr.bf16.mxu1 %v1715_v5 }
 0x2e0   : > { %v1644_v51 = vld [vmem:[%s1836_s11] sm:$0xff]  }
 0x2e1   : > { %v951_v53 = vpop.f32.mrf.mxu1 }
 0x2e2   : > { %v952_v54 = vadd.f32 %v1447_v52, %v951_v53  ;;  %1560 = vmatpush3.bf16.msra.mxu1 %v1644_v51 }
 0x2e3   : > { %v1549_v55 = vpop.f32.mrf.mxu1  ;;  %1573 = vmatprep.subr.bf16.mxu1 %v1715_v5 }
 0x2e4   : > { %v957_v56 = vsel %vm560_vm3, %v952_v54, -inf }
 0x2e5   : > { %958 = vmax.xlane.f32.xlu1 %v957_v56  ;;  %v954_v57 = vpop.f32.mrf.mxu1 }
 0x2e7   : > { %v1550_v58 = vpop.f32.mrf.mxu1 }
 0x356   : > { %v609_v59 = vpop.xlane.xlu1 %608 }
 0x357   : > { %v610_v60 = vsub.f32 %v602_v33, %v609_v59 }
 0x359   : > { %v611_v61 = vmul.f32 1.442695, %v610_v60 }
 0x35b   : > { %1653 = vpow2.f32 %v611_v61 }
 0x35e   : > { %v723_v62 = vpop.xlane.xlu0 %722 }
 0x35f   : > { %v724_v63 = vsub.f32 %v716_v40, %v723_v62 }
 0x361   : > { %v725_v0 = vmul.f32 1.442695, %v724_v63 }
 0x363   : > { %1655 = vpow2.f32 %v725_v0 }
 0x366   : > { %v841_v2 = vpop.xlane.xlu0 %840 }
 0x367   : > { %v842_v3 = vsub.f32 %v834_v47, %v841_v2 }
 0x368   : > { %v1654_v4 = vpop.eup %1653 }
 0x369   : > { %v843_v6 = vmul.f32 1.442695, %v842_v3  ;;  %v613_v7 = vsel %vm560_vm3, %v1654_v4, 0.0 }
 0x36a   : > { %614 = vadd.xlane.f32.xlu0 %v613_v7 }
 0x36b   : > { %1657 = vpow2.f32 %v843_v6 }
 0x36e   : > { %v959_v12 = vpop.xlane.xlu1 %958 }
 0x36f   : > { %v960_v13 = vsub.f32 %v952_v54, %v959_v12 }
 0x370   : > { %v1656_v8 = vpop.eup %1655 }
 0x371   : > { %v727_v9 = vsel %vm560_vm3, %v1656_v8, 0.0  ;;  %v961_v14 = vmul.f32 1.442695, %v960_v13 }
 0x372   : > { %728 = vadd.xlane.f32.xlu1 %v727_v9  ;;  %v1645_v9 = vld [vmem:[%s1845_s0 + $0x8] sm:$0xff]  }
 0x373   : > { %1659 = vpow2.f32 %v961_v14  ;;  %v1453_v14 = vld [vmem:[%s453_s22] ss:$0 sm:$0xff] }
 0x378   : > { %v1658_v10 = vpop.eup %1657 }
 0x379   : > { %v845_v11 = vsel %vm560_vm3, %v1658_v10, 0.0 }
 0x37a   : > { %846 = vadd.xlane.f32.xlu0 %v845_v11 }
 0x380   : > { %v1660_v15 = vpop.eup %1659 }
 0x381   : > { %v963_v17 = vsel %vm560_vm3, %v1660_v15, 0.0 }
 0x383   : > { %733 = vrot.lane.b32.xlu1 %v1881_v16, %s1724_s24 }
 0x390   : > { %619 = vrot.lane.b32.xlu0 %v1881_v16, %s1725_s23 }
 0x394   : > { %969 = vrot.lane.b32.xlu0 %v1881_v16, %s1726_s25 }
 0x3a7   : > { %964 = vadd.xlane.f32.xlu1 %v963_v17 }
 0x3b8   : > { %851 = vrot.lane.b32.xlu1 %v1881_v16, %s1727_s26 }
 0x3f3   : > { %v615_v18 = vpop.xlane.xlu0 %614 }
 0x3f4   : > { %1661 = vrcp.f32 %v615_v18 }
 0x3fb   : > { %v729_v19 = vpop.xlane.xlu1 %728 }
 0x3fc   : > { %1663 = vrcp.f32 %v729_v19  ;;  %v1647_v19 = vld [vmem:[%s1856_s12 + $0x18] sm:$0xff]  }
 0x3ff   : > { %v734_v25 = vpop.permute.xlu1 %733 }
 0x400   : > { %v739_v28 = vsel %vm624_vm4, %v734_v25, 0 }
 0x401   : > { %v1662_v20 = vpop.eup %1661 }
 0x402   : > { %v617_v22 = vmul.f32 %v1662_v20, %v1654_v4  ;;  %v1648_v20 = vld [vmem:[%s1856_s12 + $0x10] sm:$0xff]  }
 0x403   : > { %v847_v21 = vpop.xlane.xlu0 %846 }
 0x404   : > { %v618_v26 = vpack.c.bf16 %v617_v22, %v617_v22  ;;  %1665 = vrcp.f32 %v847_v21  ;;  %v1649_v21 = vld [vmem:[%s1856_s12 + $0x8] sm:$0xff]   ;;  %v1650_v22 = vld [vmem:[%s1856_s12] sm:$0xff]  }
 0x407   : > { %v620_v23 = vpop.permute.xlu0 %619 }
 0x408   : > { %v626_v24 = vsel %vm624_vm4, %v620_v23, 0 }
 0x409   : > { %1516 = vmatpush3.bf16.msra.mxu0 %v626_v24  ;;  %v1664_v27 = vpop.eup %1663 }
 0x40a   : > { %1527 = vmatprep.subr.bf16.mxu0 %v1715_v5  ;;  %v731_v16 = vmul.f32 %v1664_v27, %v1656_v8 }
 0x40b   : > { %v970_v35 = vpop.permute.xlu0 %969 }
 0x40c   : > { %1518 = vmatmul.mubr.msk.bf16.vlgmr.msra.gmra.mxu0 %vm560_vm3, %v618_v26  ;;  %v732_v29 = vpack.c.bf16 %v731_v16, %v731_v16  ;;  %v975_v37 = vsel %vm624_vm4, %v970_v35, 0 }
 0x40d   : > { %1528 = vmatpush3.bf16.msra.mxu0 %v739_v28  ;;  %1529 = vmatprep.mubr.msk.bf16.mxu0 %vm1716_vm2, %v1715_v5 }
 0x40e   : > { %1539 = vmatprep.subr.bf16.mxu0 %v1715_v5 }
 0x411   : > { %v1666_v30 = vpop.eup %1665 }
 0x412   : > { %v849_v32 = vmul.f32 %v1666_v30, %v1658_v10  ;;  %v1646_v10 = vld [vmem:[%s1845_s0] sm:$0xff]  }
 0x414   : > { %1530 = vmatmul.mubr.msk.bf16.vlgmr.msra.gmra.mxu0 %vm560_vm3, %v732_v29  ;;  %v850_v36 = vpack.c.bf16 %v849_v32, %v849_v32 }
 0x415   : > { %1541 = vmatprep.mubr.msk.bf16.mxu0 %vm1716_vm2, %v1715_v5 }
 0x430   : > { %v965_v31 = vpop.xlane.xlu1 %964 }
 0x431   : > { %1667 = vrcp.f32 %v965_v31 }
 0x434   : > { %v852_v33 = vpop.permute.xlu1 %851 }
 0x435   : > { %v857_v34 = vsel %vm624_vm4, %v852_v33, 0 }
 0x436   : > { %1540 = vmatpush3.bf16.msra.mxu0 %v857_v34 }
 0x437   : > { %1551 = vmatprep.subr.bf16.mxu0 %v1715_v5 }
 0x439   : > { %1542 = vmatmul.mubr.msk.bf16.vlgmr.msra.gmra.mxu0 %vm560_vm3, %v850_v36 }
 0x43a   : > { %1552 = vmatpush3.bf16.msra.mxu0 %v975_v37  ;;  %1553 = vmatprep.mubr.msk.bf16.mxu0 %vm1716_vm2, %v1715_v5 }
 0x43b   : > { %1565 = vmatprep.subr.bf16.mxu0 %v1715_v5 }
 0x43e   : > { %v1668_v38 = vpop.eup %1667 }
 0x43f   : > { %v967_v39 = vmul.f32 %v1668_v38, %v1660_v15 }
 0x441   : > { %v968_v40 = vpack.c.bf16 %v967_v39, %v967_v39 }
 0x443   : > { %1554 = vmatmul.mubr.msk.bf16.vlgmr.msra.gmra.mxu0 %vm560_vm3, %v968_v40 }
 0x444   : > { %1569 = vmatprep.mubr.msk.bf16.mxu0 %vm1716_vm2, %v1715_v5  ;;  %1566 = vmatpush3.bf16.msra.mxu0 %v1645_v9 }
 0x445   : > { %1567 = vmatprep.subr.bf16.mxu0 %v1715_v5 }
 0x448   : > { %1568 = vmatpush3.bf16.msra.mxu0 %v1646_v10 }
 0x4cc   : > { %v662_v41 = vpop.f32.mrf.mxu0 }
 0x4cd   : > { %668 = vst.msk [vmem:[#allocation3] sm:$0xff] %vm560_vm3, %v662_v41 }
 0x4ce   : > { %v1519_v42 = vpop.f32.mrf.mxu0 }
 0x4d0   : > { %v665_v43 = vpop.f32.mrf.mxu0 }
 0x4d2   : > { %v1520_v44 = vpop.f32.mrf.mxu0 }
 0x4d4   : > { %v775_v45 = vpop.f32.mrf.mxu0 }
 0x4d5   : > { %782 = vrot.lane.b32.xlu1 %v775_v45, %s1728_s29 }
 0x4d6   : > { %v1531_v46 = vpop.f32.mrf.mxu0 }
 0x4d8   : > { %v778_v47 = vpop.f32.mrf.mxu0 }
 0x4da   : > { %v1532_v48 = vpop.f32.mrf.mxu0 }
 0x4f9   : > { %v893_v50 = vpop.f32.mrf.mxu0 }
 0x4fa   : > { %900 = vrot.lane.b32.xlu0 %v893_v50, %s1729_s1 }
 0x4fb   : > { %v1543_v52 = vpop.f32.mrf.mxu0 }
 0x4fd   : > { %v896_v53 = vpop.f32.mrf.mxu0 }
 0x4ff   : > { %v1544_v54 = vpop.f32.mrf.mxu0 }
 0x503   : > { %v1011_v55 = vpop.f32.mrf.mxu0 }
 0x504   : > { %1018 = vrot.lane.b32.xlu1 %v1011_v55, %s1730_s17 }
 0x505   : > { %v1555_v56 = vpop.f32.mrf.mxu0 }
 0x507   : > { %v1014_v57 = vpop.f32.mrf.mxu0 }
 0x509   : > { %v1556_v58 = vpop.f32.mrf.mxu0 }
 0x547   : > { %v783_v59 = vpop.permute.xlu1 %782 }
 0x548   : > { %786 = vst.msk [vmem:[#allocation3] sm:$0xff] %vm785_vm5, %v783_v59 }
 0x56c   : > { %v901_v60 = vpop.permute.xlu0 %900 }
 0x56d   : > { %904 = vst.msk [vmem:[#allocation3] sm:$0xff] %vm903_vm6, %v901_v60 }
 0x576   : > { %v1019_v61 = vpop.permute.xlu1 %1018 }
 0x577   : > { %1022 = vst.msk [vmem:[#allocation3] sm:$0xff] %vm1021_vm7, %v1019_v61 }
 0x57e   : > { %v1023_v62 = vld [vmem:[#allocation3] sm:$0xff] }
 0x57f   : > { %v1024_v63 = vpack.c.bf16 %v1023_v62, %v1023_v62 }
 0x581   : > { %1562 = vmatmul.mubr.msk.bf16.vlgmr.msra.gmra.mxu1 %vm479_vm1, %v1024_v63 }
 0x582   : > { %1581 = vmatprep.mubr.msk.bf16.mxu1 %vm1716_vm2, %v1715_v5  ;;  %1574 = vmatpush3.bf16.msra.mxu1 %v1647_v19 }
 0x583   : > { %1575 = vmatprep.subr.bf16.mxu1 %v1715_v5 }
 0x586   : > { %1576 = vmatpush3.bf16.msra.mxu1 %v1648_v20 }
 0x587   : > { %1577 = vmatprep.subr.bf16.mxu1 %v1715_v5 }
 0x58a   : > { %1578 = vmatpush3.bf16.msra.mxu1 %v1649_v21 }
 0x58b   : > { %1579 = vmatprep.subr.bf16.mxu1 %v1715_v5 }
 0x58e   : > { %1580 = vmatpush3.bf16.msra.mxu1 %v1650_v22 }
 0x641   : > { %v1078_v0 = vpop.f32.mrf.mxu1 }
 0x642   : > { %v1084_v2 = vadd.f32 %v1078_v0, %v1859_v1 }
 0x643   : > { %v1563_v3 = vpop.f32.mrf.mxu1 }
 0x644   : > { %v1086_v4 = vmul.f32 %v1084_v2, %v1084_v2 }
 0x645   : > { %v1081_v6 = vpop.f32.mrf.mxu1 }
 0x646   : > { %v1087_v7 = vsel %vm479_vm1, %v1086_v4, 0.0 }
 0x647   : > { %1088 = vadd.xlane.f32.xlu0 %v1087_v7  ;;  %v1564_v8 = vpop.f32.mrf.mxu1 }
 0x6d0   : > { %v1089_v11 = vpop.xlane.xlu0 %1088 }
 0x6d1   : > { %v1090_v12 = vmul.f32 0.03125, %v1089_v11 }
 0x6d3   : > { %v1091_v1 = vadd.f32 1e-06, %v1090_v12 }
 0x6d5   : > { %1669 = vrsqrt.f32 %v1091_v1 }
 0x6e2   : > { %v1670_v13 = vpop.eup %1669 }
 0x6e3   : > { %v1093_v15 = vmul.f32 %v1670_v13, %v1084_v2 }
 0x6e5   : > { %v1100_v17 = vmul.f32 %v1453_v14, %v1093_v15 }
 0x6e7   : > { %v1101_v18 = vpack.c.bf16 %v1100_v17, %v1100_v17 }
 0x6e9   : > { %1570 = vmatmul.mubr.msk.bf16.vlgmr.msra.gmra.mxu0 %vm479_vm1, %v1101_v18 }
 0x7a9   : > { %v1155_v23 = vpop.f32.mrf.mxu0 }
 0x7aa   : > { %1171 = vrot.lane.b32.xlu1 %v1155_v23, %s1725_s23  ;;  %v1162_v27 = vmul.f32 0.044715, %v1155_v23  ;;  %v1161_v33 = vmul.f32 0.5, %v1155_v23 }
 0x7ab   : > { %v1571_v24 = vpop.f32.mrf.mxu0 }
 0x7ac   : > { %v1163_v28 = vmul.f32 %v1162_v27, %v1155_v23 }
 0x7ad   : > { %v1158_v25 = vpop.f32.mrf.mxu0 }
 0x7ae   : > { %v1164_v16 = vmul.f32 %v1163_v28, %v1155_v23 }
 0x7af   : > { %v1572_v26 = vpop.f32.mrf.mxu0 }
 0x7b0   : > { %v1165_v29 = vadd.f32 %v1164_v16, %v1155_v23 }
 0x7b2   : > { %v1166_v30 = vmul.f32 0.7978846, %v1165_v29 }
 0x7b4   : > { %1671 = vtanh.f32 %v1166_v30 }
 0x7c1   : > { %v1672_v31 = vpop.eup %1671 }
 0x7c2   : > { %v1168_v32 = vadd.f32 1.0, %v1672_v31 }
 0x7c4   : > { %v1169_v34 = vmul.f32 %v1168_v32, %v1161_v33 }
 0x81c   : > { %v1172_v35 = vpop.permute.xlu1 %1171 }
 0x81d   : > { %v1174_v5 = vmul.f32 %v1172_v35, %v1169_v34 }
 0x81f   : > { %v1175_v36 = vpack.c.bf16 %v1174_v5, %v1174_v5 }
 0x821   : > { %1582 = vmatmul.mubr.msk.bf16.vlgmr.msra.gmra.mxu1 %vm1208_vm8, %v1175_v36 }
 0x8e1   : > { %v1246_v37 = vpop.f32.mrf.mxu1 }
 0x8e2   : > { %v1252_v38 = vadd.f32 %v1246_v37, %v1084_v2 }
 0x8e3   : > { %v1583_v39 = vpop.f32.mrf.mxu1  ;;  %1257 = sbr.rel (%p1462_p8) target bundleno = 2444 (0x98c), region = 64 }
 0x8e4   : > { %1253 = vst.msk [vmem:[#allocation2] sm:$0xff] %vm479_vm1, %v1252_v38 }
 0x8e5   : > { %v1249_v40 = vpop.f32.mrf.mxu1 }
 0x8e7   : > { %v1584_v41 = vpop.f32.mrf.mxu1 }
 0x8e8   : > { %v1259_v42 = vmul.f32 %v1252_v38, %v1252_v38  ;;  %v1463_v48 = vld [vmem:[%s2006_s8] ss:$0 sm:$0xff] }
 0x8ea   : > { %v1260_v43 = vsel %vm479_vm1, %v1259_v42, 0.0 }
 0x8eb   : > { %1261 = vadd.xlane.f32.xlu0 %v1260_v43 }
 0x974   : > { %v1262_v44 = vpop.xlane.xlu0 %1261 }
 0x975   : > { %v1263_v45 = vmul.f32 0.03125, %v1262_v44 }
 0x977   : > { %v1264_v46 = vadd.f32 1e-06, %v1263_v45 }
 0x979   : > { %1673 = vrsqrt.f32 %v1264_v46 }
 0x986   : > { %v1674_v47 = vpop.eup %1673 }
 0x987   : > { %v1266_v49 = vmul.f32 %v1674_v47, %v1252_v38 }
 0x989   : > { %v1273_v50 = vmul.f32 %v1463_v48, %v1266_v49 }
 0x98b   : > { %1274 = vst.msk [vmem:[%s1851_s15] sm:$0xff] %vm479_vm1, %v1273_v50 }
 0x98c PF: > { %s19_s13 = sadd.s32 1, %s1713_s13   ;;  %s2019_s30 = sld [smem:[#allocation4_spill]] }
 0x98d   : > { %p16_p9 = scmp.ge.s32.totalorder %s19_s13, 6   ;;  %s2020_s10 = sld [smem:[#allocation5_spill]] }
 0x98e   : > { %s2021_s11 = sld [smem:[#allocation6_spill]] }
 0x98f   : > { %s2022_s12 = sld [smem:[#allocation7_spill]]  ;;  %18 = sbr.rel (!%p16_p9) target bundleno = 4 (0x4), region = 118 }

// kernel: _lambda_.3
= control target key start
LH: loop header
LB: loop body
LE: loop exit
PB: predicated region body
PF: predicated region fallthrough
CT: control target
= control target key end

     0   :  { %s2883_s0 = inlined_call_operand.vmem [shape: f32[2,1,32], index: 0, kind: input, shape index: {}]   ;;  %s2884_s1 = inlined_call_operand.vmem [shape: f32[2,8,32], index: 1, kind: input, shape index: {}]   ;;  %s2885_s2 = inlined_call_operand.vmem [shape: f32[4,1,1], index: 2, kind: input, shape index: {}]   ;;  %s2886_s3 = inlined_call_operand.vmem [shape: f32[2,1,8], index: 3, kind: input, shape index: {}]   ;;  %s2887_s4 = inlined_call_operand.vmem [shape: f32[2,1,32], index: 4, kind: input, shape index: {}]   ;;  %s2888_s5 = inlined_call_operand.vmem [shape: bf16[2,32,96], index: 5, kind: input, shape index: {}]   ;;  %s2889_s6 = inlined_call_operand.vmem [shape: bf16[2,32,32], index: 6, kind: input, shape index: {}]   ;;  %s2890_s7 = inlined_call_operand.vmem [shape: f32[2,1,32], index: 7, kind: input, shape index: {}]   ;;  %s2891_s8 = inlined_call_operand.vmem [shape: bf16[2,32,32], index: 8, kind: input, shape index: {}]   ;;  %s2892_s9 = inlined_call_operand.vmem [shape: bf16[2,32,64], index: 9, kind: input, shape index: {}]   ;;  %s2893_s10 = inlined_call_operand.vmem [shape: bf16[2,32,32], index: 10, kind: input, shape index: {}]   ;;  %s2894_s11 = inlined_call_operand.vmem [shape: f32[2,1,32], index: 11, kind: input, shape index: {}]   ;;  %s2895_s12 = inlined_call_operand.vmem [shape: bf16[2,32,128], index: 12, kind: input, shape index: {}]   ;;  %s2896_s13 = inlined_call_operand.vmem [shape: bf16[2,64,32], index: 13, kind: input, shape index: {}]   ;;  %s2897_s14 = inlined_call_operand.vmem [shape: f32[1,32], index: 14, kind: input, shape index: {}]   ;;  %s2898_s15 = inlined_call_operand.vmem [shape: bf16[32,128], index: 15, kind: input, shape index: {}]   ;;  %s2899_s16 = inlined_call_operand.hbm [shape: f32[2,1,128], index: 16, kind: output, shape index: {}]  }
   0x1   :  { %2914 = sst [smem:[#allocation19_spill]] %s2883_s0 }
   0x2   :  { %2915 = sst [smem:[#allocation20_spill]] %s2884_s1 }
   0x3   :  { %2916 = sst [smem:[#allocation21_spill]] %s2886_s3 }
   0x4   :  { %2917 = sst [smem:[#allocation22_spill]] %s2888_s5 }
   0x5   :  { %2918 = sst [smem:[#allocation23_spill]] %s2889_s6 }
   0x6   :  { %2919 = sst [smem:[#allocation24_spill]] %s2891_s8 }
   0x7   :  { %2920 = sst [smem:[#allocation25_spill]] %s2892_s9 }
   0x8   :  { %2921 = sst [smem:[#allocation26_spill]] %s2895_s12 }
   0x9   :  { %2922 = sst [smem:[#allocation27_spill]] %s2896_s13 }
   0xa   :  { %2923 = sst [smem:[#allocation28_spill]] %s2897_s14 }
   0xb   :  { %2924 = sst [smem:[#allocation29_spill]] %s2898_s15 }
   0xc   :  { %2925 = sst [smem:[#allocation30_spill]] %s2899_s16 }
   0xd   :  { %21 = vsyncpa [#allocation5], 0 }
   0xe   :  { %23 = vsyncpa [#allocation5 + $0x1], 0  ;;  %s2536_s20 = smov 0   ;;  %s2538_s2 = smov 0  }
   0xf   :  { %s2540_s21 = smov 0   ;;  %s2542_s22 = smov 0  }
  0x10   :  { %s2544_s23 = smov 0   ;;  %s2546_s24 = smov 0  }
  0x11   :  { %s2548_s25 = smov 0   ;;  %s2550_s26 = smov 0  }
  0x12 LB: > { %2926 = sst [smem:[#allocation7_spill]] %s2405_s20  ;;  %s1987_s27 = sadd.s32 4294967295, %s2433_s26   ;;  %s2433_s26 = sphi %s2550_s26, %s29_s26   ;;  %s2429_s25 = sphi %s2548_s25, %s2973_s25   ;;  %s2425_s24 = sphi %s2546_s24, %s2969_s24   ;;  %s2421_s23 = sphi %s2544_s23, %s2968_s23   ;;  %s2417_s22 = sphi %s2542_s22, %s2967_s22   ;;  %s2413_s21 = sphi %s2540_s21, %s2966_s21   ;;  %s2409_s2 = sphi %s2538_s2, %s2972_s2   ;;  %s2405_s20 = sphi %s2536_s20, %s2971_s20  }
  0x13   : > { %2927 = sst [smem:[#allocation8_spill]] %s2413_s21  ;;  %s1988_s28 = sadd.s32 4294967294, %s2433_s26  }
  0x14   : > { %2928 = sst [smem:[#allocation9_spill]] %s2417_s22  ;;  %s38_s29 = sadd.s32 1, %s2425_s24 }
  0x15   : > { %2929 = sst [smem:[#allocation10_spill]] %s2421_s23  ;;  %p39_p0 = scmp.ge.s32.totalorder %s38_s29, 2 }
  0x16   : > { %2930 = sst [smem:[#allocation11_spill]] %s2425_s24  ;;  %s41_s0 = sadd.s32 1, %s2429_s25 }
  0x17   : > { %2931 = sst [smem:[#allocation12_spill]] %s2429_s25  ;;  %p459_p1 = scmp.ne.s32.totalorder %s2413_s21, %s2409_s2 }
  0x18   : > { %2932 = sst [smem:[#allocation13_spill]] %s2433_s26  ;;  %p460_p2 = scmp.eq.s32.totalorder %s1987_s27, 3 }
  0x19   : > { %s2975_s29 = smov (%p39_p0, %s38_s29), 0  ;;  %s2977_s0 = smov (!%p39_p0, %s41_s0), %s2429_s25 }
  0x1a   : > { %2933 = sst [smem:[#allocation14_spill]] %s2975_s29  ;;  %p2585_p3 = por %p460_p2, %p459_p1 }
  0x1b   : > { %p465_p4 = scmp.ne.s32.totalorder %s2409_s2, %s2405_s20  ;;  %p43_p5 = scmp.ge.s32.totalorder %s2977_s0, 2 }
  0x1c   : > { %s2934_s30 = scalar_select %p2585_p3, 1, 0 }
  0x1d   : > { %p466_p6 = scmp.eq.s32.totalorder %s1988_s28, 3  ;;  %p1991_p7 = scmp.ge.s32.totalorder %s2433_s26, 1 }
  0x1e   : > { %2935 = sst [smem:[#allocation15_spill]] %s2934_s30  ;;  %p586_p8 = scmp.lt.s32.totalorder %s2433_s26, 5 }
  0x1f   : > { %s2979_s0 = smov (%p43_p5, %s2977_s0), 0  ;;  %p2595_p9 = por %p466_p6, %p465_p4 }
  0x20   : > { %2936 = sst [smem:[#allocation16_spill]] %s2979_s0  ;;  %p587_p10 = pnand %p1991_p7, %p586_p8 }
  0x21   : > { %s2937_s17 = scalar_select %p2595_p9, 1, 0 }
  0x22   : > { %s446_s18 = ssub.s32 %s2429_s25, %s2979_s0  ;;  %s449_s19 = sadd.s32 1, %s2413_s21 }
  0x23   : > { %2938 = sst [smem:[#allocation17_spill]] %s2937_s17  ;;  %p447_p11 = scmp.eq.s32.totalorder %s446_s18, 0 }
  0x24   : > { %590 = sbr.rel (%p587_p10) target bundleno = 3216 (0xc90), region = 84  ;;  %p684_p12 = scmp.lt.s32.totalorder (!%p587_p10), %s2421_s23, 1 }
  0x25   : > { %s2603_s27 = scalar_select %p447_p11, %s2413_s21, %s449_s19  }
  0x26   : > { %p694_p13 = scmp.lt.s32.totalorder (!%p587_p10), %s2417_s22, 1  ;;  %s2940_s19 = sld [smem:[#allocation19_spill]] (!%p587_p10) }
  0x27   : > { %2939 = sst [smem:[#allocation18_spill]] %s2603_s27 }
  0x28   : > { %s2941_s1 = sld [smem:[#allocation20_spill]] (!%p587_p10) }
  0x29   : > { %s2609_s29 = scalar_select %p684_p12, %s2421_s23, 1 }
  0x2a   : > { %s2612_s24 = scalar_select %p694_p13, %s2417_s22, 1 }
  0x2b   : > { %s1992_s28 = sshll.u32 %s2609_s29, 3  ;;  %s2943_s5 = sld [smem:[#allocation22_spill]] }
  0x2c   : > { %s686_s25 = scalar_lea.vmem %s2940_s19, %s2609_s29  ;;  %s2046_s18 = sshll.u32 %s2612_s24, 4 }
  0x2d   : > { %s2944_s6 = sld [smem:[#allocation23_spill]]  ;;  %s2658_s13 = scalar_lea.vmem %s2893_s10, %s2046_s18 }
  0x2e   : > { %s2622_s17 = scalar_lea.vmem %s2941_s1, %s1992_s28  ;;  %s2945_s8 = sld [smem:[#allocation24_spill]] }
  0x2f   : > { %s2946_s9 = sld [smem:[#allocation25_spill]]  ;;  %s727_s21 = scalar_lea.vmem %s2894_s11, %s2612_s24 }
  0x30   : > { %s2052_s26 = sshll.u32 %s2612_s24, 5  ;;  %s2948_s23 = sld [smem:[#allocation27_spill]] }
  0x31   : > { %s701_s19 = scalar_lea.vmem %s2943_s5, %s2046_s18  ;;  %s2947_s5 = sld [smem:[#allocation26_spill]] }
  0x32   : > { %s2950_s14 = sld [smem:[#allocation9_spill]] }
  0x33   : > { %s2639_s12 = scalar_lea.vmem %s2944_s6, %s2046_s18 }
  0x34   : > { %s2648_s16 = scalar_lea.vmem %s2945_s8, %s2046_s18 }
  0x35   : > { %s2653_s0 = scalar_lea.vmem %s2946_s9, %s2046_s18  ;;  %s2949_s9 = sand.u32 1, %s2409_s2  }
  0x36   : > { %s2673_s30 = scalar_lea.vmem %s2948_s23, %s2052_s26  ;;  %s2677_s3 = scalar_lea.vmem [#allocation4], %s2949_s9 }
  0x37   : > { %s2667_s20 = scalar_lea.vmem %s2947_s5, %s2046_s18 }
  0x38   : > { %p2007_p0 = scmp.ne.s32.totalorder %s2950_s14, 0 }
  0x3a   : > { %742 = sbr.rel (%p2007_p0) target bundleno = 65 (0x41), region = 88 }
  0x3f   : > { %v743_v0 = vld [vmem:[%s686_s25] sm:$0x1]  ;;  %vm744_vm0 = vcmask 253952  }
  0x40   : > { %745 = vst.msk [vmem:[#allocation2] sm:$0x1] %vm744_vm0, %v743_v0 }
  0x41 PF: > { %vm751_vm1 = vcmask 253952   ;;  %v2298_v3 = vld [vmem:[%s701_s19] sm:$0xff]   ;;  %s2435_s1 = smov 64   ;;  %v2436_v5 = vmov 0.0   ;;  %v2297_v6 = vld [vmem:[%s701_s19 + $0x8] sm:$0xff]   ;;  %vm2437_vm2 = vmmov 0   ;;  %s2951_s8 = scalar_lea.vmem %s2887_s4, %s2612_s24 }
  0x42   : > { %776 = vrot.lane.b32.xlu1 %v2298_v3, %s2435_s1  ;;  %2095 = vmatprep.subr.bf16.mxu1 %v2436_v5  ;;  %v749_v13 = vld [vmem:[%s2951_s8] sm:$0x1]  ;;  %vm782_vm3 = vcmask 261120   ;;  %v2299_v16 = vld [vmem:[%s2639_s12 + $0x8] sm:$0xff]   ;;  %vm1019_vm4 = vcmask 64512   ;;  %s2438_s25 = smov 120  }
  0x43   : > { %2111 = vmatprep.subr.bf16.mxu0 %v2436_v5  ;;  %2099 = vmatprep.mubr.msk.bf16.mxu1 %vm2437_vm2, %v2436_v5  ;;  %v2300_v18 = vld [vmem:[%s2639_s12] sm:$0xff]   ;;  %v2301_v31 = vld [vmem:[%s2653_s0 + $0x8] sm:$0xff]   ;;  %s2953_s28 = sld [smem:[#allocation21_spill]]  ;;  %vm1066_vm5 = vcmask 57344   ;;  %s2442_s22 = smov 80   ;;  %vm1085_vm6 = vcmask 1043456  }
  0x44   : > { %2115 = vmatprep.mubr.msk.bf16.mxu0 %vm2437_vm2, %v2436_v5  ;;  %v2303_v32 = vld [vmem:[%s2648_s16 + $0x8] sm:$0xff]   ;;  %v2302_v33 = vld [vmem:[%s2653_s0] sm:$0xff]   ;;  %s2440_s0 = smov 112   ;;  %s2443_s27 = smov 96   ;;  %vm1245_vm7 = vcmask 122944   ;;  %vm1361_vm8 = vcmask 188544  }
  0x45   : > { %v747_v34 = vld [vmem:[%s2622_s17] sm:$0xff]  ;;  %2112 = vmatpush3.bf16.msra.mxu0 %v2303_v32  ;;  %s2439_s17 = smov 104   ;;  %s2444_s26 = smov 72   ;;  %vm1477_vm9 = vcmask 254144   ;;  %vm1658_vm10 = vcmask 523264  }
  0x46   : > { %v2304_v35 = vld [vmem:[%s2648_s16] sm:$0xff]   ;;  %2113 = vmatprep.subr.bf16.mxu0 %v2436_v5  ;;  %v748_v36 = vpack.c.bf16 %v747_v34, %v747_v34  ;;  %s2952_s16 = scalar_lea.vmem %s2890_s7, %s2612_s24  ;;  %s2445_s23 = smov 8  }
  0x47   : > { %v746_v1 = vld [vmem:[#allocation2] sm:$0x1]  ;;  %s2446_s14 = smov 16   ;;  %s2447_s5 = smov 24  }
  0x48   : > { %v750_v2 = vmul.f32 %v746_v1, %v746_v1  ;;  %v887_v41 = vld [vmem:[%s2952_s16] sm:$0x1]  ;;  %s2955_s24 = sld [smem:[#allocation9_spill]] }
  0x49   : > { %2114 = vmatpush3.bf16.msra.mxu0 %v2304_v35  ;;  %s2954_s15 = scalar_lea.vmem %s2953_s28, %s2609_s29  ;;  %s2441_s29 = smov 88  }
  0x4a   : > { %v752_v4 = vsel %vm751_vm1, %v750_v2, 0.0  ;;  %2127 = vmatprep.subr.bf16.mxu0 %v2436_v5 }
  0x4b   : > { %753 = vadd.xlane.f32.xlu0 %v752_v4 }
  0x4e   : > { %p2039_p1 = scmp.ne.s32.totalorder %s2955_s24, 1 }
  0x4f   : > { %s2957_s16 = sld [smem:[#allocation28_spill]] (!%p2039_p1) }
  0x61   : > { %778 = vrot.lane.b32.xlu0 %v2297_v6, %s2435_s1 }
  0xb4   : > { %v777_v11 = vpop.permute.xlu1 %776 }
  0xd4   : > { %v754_v7 = vpop.xlane.xlu0 %753 }
  0xd5   : > { %v756_v8 = vmul.f32 0.03125, %v754_v7 }
  0xd7   : > { %v757_v9 = vadd.f32 1e-06, %v756_v8 }
  0xd8   : > { %v779_v10 = vpop.permute.xlu0 %778 }
  0xd9   : > { %2313 = vrsqrt.f32 %v757_v9  ;;  %2096 = vmatpush3.bf16.msra.mxu1 %v779_v10 }
  0xda   : > { %2097 = vmatprep.subr.bf16.mxu1 %v2436_v5 }
  0xdd   : > { %2098 = vmatpush3.bf16.msra.mxu1 %v777_v11 }
  0xde   : > { %2103 = vmatprep.subr.bf16.mxu1 %v2436_v5 }
  0xe6   : > { %v2314_v12 = vpop.eup %2313 }
  0xe7   : > { %v759_v14 = vmul.f32 %v2314_v12, %v746_v1 }
  0xe9   : > { %v760_v15 = vmul.f32 %v759_v14, %v749_v13 }
  0xeb   : > { %v761_v17 = vpack.c.bf16 %v760_v15, %v760_v15 }
  0xed   : > { %2100 = vmatmul.mubr.msk.bf16.vlgmr.msra.gmra.mxu1 %vm782_vm3, %v761_v17 }
  0xee   : > { %2104 = vmatpush3.bf16.msra.mxu1 %v2299_v16  ;;  %2107 = vmatprep.mubr.msk.bf16.mxu1 %vm2437_vm2, %v2436_v5 }
  0xef   : > { %2105 = vmatprep.subr.bf16.mxu1 %v2436_v5 }
  0xf2   : > { %2106 = vmatpush3.bf16.msra.mxu1 %v2300_v18 }
  0xf3   : > { %2119 = vmatprep.subr.bf16.mxu1 %v2436_v5 }
 0x1ad   : > { %v820_v19 = vpop.f32.mrf.mxu1 }
 0x1ae   : > { %v826_v20 = vpack.c.bf16 %v820_v19, %v820_v19 }
 0x1af   : > { %v2101_v21 = vpop.f32.mrf.mxu1 }
 0x1b0   : > { %2108 = vmatmul.mubr.msk.bf16.vlgmr.msra.gmra.mxu1 %vm782_vm3, %v826_v20 }
 0x1b1   : > { %v823_v22 = vpop.f32.mrf.mxu1  ;;  %2123 = vmatprep.mubr.msk.bf16.mxu1 %vm2437_vm2, %v2436_v5  ;;  %2120 = vmatpush3.bf16.msra.mxu1 %v2301_v31 }
 0x1b2   : > { %2121 = vmatprep.subr.bf16.mxu1 %v2436_v5 }
 0x1b3   : > { %v2102_v23 = vpop.f32.mrf.mxu1 }
 0x1b5   : > { %2122 = vmatpush3.bf16.msra.mxu1 %v2302_v33 }
 0x1b6   : > { %2133 = vmatprep.subr.bf16.mxu1 %v2436_v5 }
 0x1b8   : > { %2124 = vmatmul.mubr.msk.bf16.vlgmr.msra.gmra.mxu1 %vm782_vm3, %v748_v36 }
 0x1b9   : > { %2135 = vmatprep.mubr.msk.bf16.mxu1 %vm2437_vm2, %v2436_v5 }
 0x270   : > { %v880_v24 = vpop.f32.mrf.mxu1 }
 0x271   : > { %v2706_v25 = vadd.f32 %v880_v24, %v746_v1  ;;  %v1016_v1 = vld [vmem:[%s2954_s15] sm:$0x1] }
 0x272   : > { %v2109_v26 = vpop.f32.mrf.mxu1 }
 0x273   : > { %v888_v27 = vmul.f32 %v2706_v25, %v2706_v25 }
 0x274   : > { %v883_v28 = vpop.f32.mrf.mxu1 }
 0x275   : > { %v889_v29 = vsel %vm751_vm1, %v888_v27, 0.0 }
 0x276   : > { %890 = vadd.xlane.f32.xlu1 %v889_v29  ;;  %v2110_v30 = vpop.f32.mrf.mxu1 }
 0x278   : > { %v1010_v45 = vpop.f32.mrf.mxu1 }
 0x279   : > { %v2732_v46 = vpack.c.bf16 %v1010_v45, %v1010_v45 }
 0x27a   : > { %v2125_v47 = vpop.f32.mrf.mxu1 }
 0x27b   : > { %1133 = vrot.lane.b32.xlu0 %v2732_v46, %s2438_s25  ;;  %v1024_v48 = vsel %vm1019_vm4, %v2732_v46, 0 }
 0x27c   : > { %v1013_v49 = vpop.f32.mrf.mxu1 }
 0x27e   : > { %v2126_v50 = vpop.f32.mrf.mxu1 }
 0x287   : > { %1365 = vrot.lane.b32.xlu1 %v2732_v46, %s2439_s17 }
 0x2ed   : > { %v1134_v51 = vpop.permute.xlu0 %1133 }
 0x2ee   : > { %v1139_v54 = vsel %vm1019_vm4, %v1134_v51, 0 }
 0x2ff   : > { %v891_v37 = vpop.xlane.xlu1 %890 }
 0x300   : > { %v892_v38 = vmul.f32 0.03125, %v891_v37 }
 0x302   : > { %v893_v39 = vadd.f32 1e-06, %v892_v38 }
 0x303   : > { %v1366_v61 = vpop.permute.xlu1 %1365 }
 0x304   : > { %2315 = vrsqrt.f32 %v893_v39  ;;  %v1371_v63 = vsel %vm1019_vm4, %v1366_v61, 0 }
 0x311   : > { %v2316_v40 = vpop.eup %2315 }
 0x312   : > { %v895_v42 = vmul.f32 %v2316_v40, %v2706_v25 }
 0x314   : > { %v896_v43 = vmul.f32 %v895_v42, %v887_v41 }
 0x316   : > { %v897_v44 = vpack.c.bf16 %v896_v43, %v896_v43 }
 0x318   : > { %2116 = vmatmul.mubr.msk.bf16.vlgmr.msra.gmra.mxu0 %vm782_vm3, %v897_v44 }
 0x319   : > { %2129 = vmatprep.mubr.msk.bf16.mxu0 %vm2437_vm2, %v2436_v5  ;;  %2128 = vmatpush3.bf16.xpose.msra.mxu0 %v1024_v48 }
 0x31a   : > { %2139 = vmatprep.subr.bf16.mxu0 %v2436_v5 }
 0x3d8   : > { %v951_v52 = vpop.f32.mrf.mxu0 }
 0x3d9   : > { %v1017_v53 = vpack.c.bf16 %v951_v52, %v951_v52 }
 0x3da   : > { %v2117_v55 = vpop.f32.mrf.mxu0 }
 0x3db   : > { %1131 = vrot.lane.b32.xlu0 %v1017_v53, %s2438_s25  ;;  %2130 = vmatmul.mubr.msk.bf16.vlgmr.msra.gmra.mxu0 %vm1019_vm4, %v1017_v53 }
 0x3dc   : > { %v954_v56 = vpop.f32.mrf.mxu0  ;;  %2140 = vmatpush3.bf16.xpose.msra.mxu0 %v1139_v54  ;;  %2141 = vmatprep.mubr.msk.bf16.mxu0 %vm2437_vm2, %v2436_v5 }
 0x3dd   : > { %2151 = vmatprep.subr.bf16.mxu0 %v2436_v5 }
 0x3de   : > { %v2118_v57 = vpop.f32.mrf.mxu0 }
 0x3df   : > { %1249 = vrot.lane.b32.xlu0 %v2732_v46, %s2440_s0 }
 0x3e3   : > { %1247 = vrot.lane.b32.xlu0 %v1017_v53, %s2440_s0 }
 0x3e7   : > { %1363 = vrot.lane.b32.xlu0 %v1017_v53, %s2439_s17 }
 0x44d   : > { %v1132_v58 = vpop.permute.xlu0 %1131 }
 0x44e   : > { %2142 = vmatmul.mubr.msk.bf16.vlgmr.msra.gmra.mxu0 %vm1019_vm4, %v1132_v58 }
 0x44f   : > { %2153 = vmatprep.mubr.msk.bf16.mxu0 %vm2437_vm2, %v2436_v5 }
 0x451   : > { %v1250_v59 = vpop.permute.xlu0 %1249 }
 0x452   : > { %v1255_v60 = vsel %vm1019_vm4, %v1250_v59, 0 }
 0x453   : > { %2152 = vmatpush3.bf16.xpose.msra.mxu0 %v1255_v60 }
 0x454   : > { %2163 = vmatprep.subr.bf16.mxu0 %v2436_v5 }
 0x455   : > { %v1248_v62 = vpop.permute.xlu0 %1247 }
 0x459   : > { %v1364_v0 = vpop.permute.xlu0 %1363 }
 0x45a   : > { %2154 = vmatmul.mubr.msk.bf16.vlgmr.msra.gmra.mxu0 %vm1019_vm4, %v1248_v62 }
 0x45b   : > { %2164 = vmatpush3.bf16.xpose.msra.mxu0 %v1371_v63  ;;  %2165 = vmatprep.mubr.msk.bf16.mxu0 %vm2437_vm2, %v2436_v5 }
 0x45c   : > { %2175 = vmatprep.subr.bf16.mxu0 %v2436_v5 }
 0x462   : > { %2166 = vmatmul.mubr.msk.bf16.vlgmr.msra.gmra.mxu0 %vm1019_vm4, %v1364_v0 }
 0x463   : > { %2179 = vmatprep.mubr.msk.bf16.mxu0 %vm2437_vm2, %v2436_v5 }
 0x49b   : > { %v1060_v2 = vpop.f32.mrf.mxu0 }
 0x49c   : > { %v1061_v3 = vadd.f32 %v1060_v2, %v1016_v1 }
 0x49d   : > { %v2131_v4 = vpop.f32.mrf.mxu0 }
 0x49e   : > { %v1067_v6 = vsel %vm1066_vm5, %v1061_v3, -inf }
 0x49f   : > { %1068 = vmax.xlane.f32.xlu0 %v1067_v6  ;;  %v1063_v7 = vpop.f32.mrf.mxu0 }
 0x4a1   : > { %v2132_v8 = vpop.f32.mrf.mxu0 }
 0x50e   : > { %v1175_v9 = vpop.f32.mrf.mxu0 }
 0x50f   : > { %v1176_v10 = vadd.f32 %v1175_v9, %v1016_v1 }
 0x510   : > { %v2143_v11 = vpop.f32.mrf.mxu0 }
 0x511   : > { %v1181_v12 = vsel %vm1066_vm5, %v1176_v10, -inf }
 0x512   : > { %1182 = vmax.xlane.f32.xlu1 %v1181_v12  ;;  %v1178_v13 = vpop.f32.mrf.mxu0 }
 0x514   : > { %v2144_v14 = vpop.f32.mrf.mxu0 }
 0x51a   : > { %v1291_v15 = vpop.f32.mrf.mxu0 }
 0x51b   : > { %v1292_v16 = vadd.f32 %v1291_v15, %v1016_v1 }
 0x51c   : > { %v2155_v17 = vpop.f32.mrf.mxu0 }
 0x51d   : > { %v1297_v18 = vsel %vm1066_vm5, %v1292_v16, -inf }
 0x51e   : > { %1298 = vmax.xlane.f32.xlu0 %v1297_v18  ;;  %v1294_v19 = vpop.f32.mrf.mxu0  ;;  %v2306_v18 = vld [vmem:[%s2658_s13] sm:$0xff]  }
 0x520   : > { %v2156_v20 = vpop.f32.mrf.mxu0 }
 0x522   : > { %v1407_v21 = vpop.f32.mrf.mxu0 }
 0x523   : > { %v1408_v22 = vadd.f32 %v1407_v21, %v1016_v1  ;;  %1193 = vrot.lane.b32.xlu1 %v2732_v46, %s2441_s29 }
 0x524   : > { %v2167_v23 = vpop.f32.mrf.mxu0 }
 0x525   : > { %v1413_v24 = vsel %vm1066_vm5, %v1408_v22, -inf }
 0x526   : > { %1414 = vmax.xlane.f32.xlu0 %v1413_v24  ;;  %v1410_v26 = vpop.f32.mrf.mxu0 }
 0x527   : > { %1309 = vrot.lane.b32.xlu1 %v2732_v46, %s2442_s22 }
 0x528   : > { %v1069_v27 = vpop.xlane.xlu0 %1068  ;;  %v2168_v28 = vpop.f32.mrf.mxu0 }
 0x529   : > { %v1070_v29 = vsub.f32 %v1061_v3, %v1069_v27 }
 0x52b   : > { %v1071_v30 = vmul.f32 1.442695, %v1070_v29 }
 0x52d   : > { %2317 = vpow2.f32 %v1071_v30 }
 0x53a   : > { %v2318_v31 = vpop.eup %2317 }
 0x53b   : > { %v1073_v32 = vsel %vm1066_vm5, %v2318_v31, 0.0 }
 0x53c   : > { %1074 = vadd.xlane.f32.xlu0 %v1073_v32 }
 0x59b   : > { %v1183_v33 = vpop.xlane.xlu1 %1182 }
 0x59c   : > { %v1184_v34 = vsub.f32 %v1176_v10, %v1183_v33 }
 0x59e   : > { %v1185_v35 = vmul.f32 1.442695, %v1184_v34 }
 0x59f   : > { %v1194_v51 = vpop.permute.xlu1 %1193 }
 0x5a0   : > { %2319 = vpow2.f32 %v1185_v35  ;;  %v1199_v60 = vsel %vm1085_vm6, %v1194_v51, 0  ;;  %v2310_v51 = vld [vmem:[%s2673_s30 + $0x10] sm:$0xff]  }
 0x5a3   : > { %v1310_v55 = vpop.permute.xlu1 %1309 }
 0x5a4   : > { %v1315_v0 = vsel %vm1085_vm6, %v1310_v55, 0 }
 0x5a7   : > { %v1299_v36 = vpop.xlane.xlu0 %1298 }
 0x5a8   : > { %v1300_v37 = vsub.f32 %v1292_v16, %v1299_v36  ;;  %v2305_v16 = vld [vmem:[%s2658_s13 + $0x8] sm:$0xff]  }
 0x5a9   : > { %2176 = vmatpush3.bf16.msra.mxu0 %v2305_v16 }
 0x5aa   : > { %v1301_v38 = vmul.f32 1.442695, %v1300_v37  ;;  %2177 = vmatprep.subr.bf16.mxu0 %v2436_v5 }
 0x5ac   : > { %2321 = vpow2.f32 %v1301_v38 }
 0x5ad   : > { %v2320_v39 = vpop.eup %2319  ;;  %2178 = vmatpush3.bf16.msra.mxu0 %v2306_v18 }
 0x5ae   : > { %v1187_v40 = vsel %vm1066_vm5, %v2320_v39, 0.0  ;;  %2191 = vmatprep.subr.bf16.mxu0 %v2436_v5 }
 0x5af   : > { %1188 = vadd.xlane.f32.xlu0 %v1187_v40  ;;  %v1415_v41 = vpop.xlane.xlu0 %1414  ;;  %v2307_v40 = vld [vmem:[%s2667_s20 + $0x8] sm:$0xff]  }
 0x5b0   : > { %v1416_v42 = vsub.f32 %v1408_v22, %v1415_v41  ;;  %v2308_v41 = vld [vmem:[%s2667_s20] sm:$0xff]  }
 0x5b2   : > { %v1417_v43 = vmul.f32 1.442695, %v1416_v42 }
 0x5b4   : > { %2323 = vpow2.f32 %v1417_v43 }
 0x5b9   : > { %v2322_v44 = vpop.eup %2321 }
 0x5ba   : > { %v1303_v45 = vsel %vm1066_vm5, %v2322_v44, 0.0 }
 0x5bb   : > { %1304 = vadd.xlane.f32.xlu0 %v1303_v45  ;;  %v1541_v45 = vld [vmem:[%s727_s21] sm:$0x1] }
 0x5c1   : > { %v2324_v47 = vpop.eup %2323 }
 0x5c2   : > { %v1419_v48 = vsel %vm1066_vm5, %v2324_v47, 0.0 }
 0x5c3   : > { %1420 = vadd.xlane.f32.xlu1 %v1419_v48 }
 0x5c5   : > { %v1075_v49 = vpop.xlane.xlu0 %1074 }
 0x5c6   : > { %2325 = vrcp.f32 %v1075_v49 }
 0x5d1   : > { %1080 = vrot.lane.b32.xlu0 %v2732_v46, %s2443_s27 }
 0x5d3   : > { %v2326_v52 = vpop.eup %2325 }
 0x5d4   : > { %1425 = vrot.lane.b32.xlu1 %v2732_v46, %s2444_s26  ;;  %v1077_v54 = vmul.f32 %v2326_v52, %v2318_v31  ;;  %v2311_v52 = vld [vmem:[%s2673_s30 + $0x8] sm:$0xff]  }
 0x5d6   : > { %v1078_v58 = vpack.c.bf16 %v1077_v54, %v1077_v54 }
 0x638   : > { %v1189_v50 = vpop.xlane.xlu0 %1188 }
 0x639   : > { %2327 = vrcp.f32 %v1189_v50  ;;  %v2309_v50 = vld [vmem:[%s2673_s30 + $0x18] sm:$0xff]  }
 0x644   : > { %v1305_v53 = vpop.xlane.xlu0 %1304 }
 0x645   : > { %2329 = vrcp.f32 %v1305_v53  ;;  %v2312_v53 = vld [vmem:[%s2673_s30] sm:$0xff]   ;;  %s2956_s30 = sld [smem:[#allocation29_spill]] (!%p2039_p1) }
 0x646   : > { %v2328_v59 = vpop.eup %2327 }
 0x647   : > { %v1191_v61 = vmul.f32 %v2328_v59, %v2320_v39 }
 0x648   : > { %v1081_v56 = vpop.permute.xlu0 %1080 }
 0x649   : > { %v1087_v57 = vsel %vm1085_vm6, %v1081_v56, 0  ;;  %v1192_v62 = vpack.c.bf16 %v1191_v61, %v1191_v61 }
 0x64a   : > { %2134 = vmatpush3.bf16.msra.mxu1 %v1087_v57 }
 0x64b   : > { %2145 = vmatprep.subr.bf16.mxu1 %v2436_v5 }
 0x64c   : > { %v1421_v46 = vpop.xlane.xlu1 %1420 }
 0x64d   : > { %2136 = vmatmul.mubr.msk.bf16.vlgmr.msra.gmra.mxu1 %vm1019_vm4, %v1078_v58  ;;  %2331 = vrcp.f32 %v1421_v46 }
 0x64e   : > { %2146 = vmatpush3.bf16.msra.mxu1 %v1199_v60  ;;  %2147 = vmatprep.mubr.msk.bf16.mxu1 %vm2437_vm2, %v2436_v5 }
 0x64f   : > { %2157 = vmatprep.subr.bf16.mxu1 %v2436_v5 }
 0x650   : > { %v1426_v2 = vpop.permute.xlu1 %1425 }
 0x651   : > { %v1431_v6 = vsel %vm1085_vm6, %v1426_v2, 0 }
 0x652   : > { %v2330_v63 = vpop.eup %2329 }
 0x653   : > { %v1307_v1 = vmul.f32 %v2330_v63, %v2322_v44 }
 0x655   : > { %2148 = vmatmul.mubr.msk.bf16.vlgmr.msra.gmra.mxu1 %vm1019_vm4, %v1192_v62  ;;  %v1308_v3 = vpack.c.bf16 %v1307_v1, %v1307_v1 }
 0x656   : > { %2158 = vmatpush3.bf16.msra.mxu1 %v1315_v0  ;;  %2159 = vmatprep.mubr.msk.bf16.mxu1 %vm2437_vm2, %v2436_v5 }
 0x657   : > { %2169 = vmatprep.subr.bf16.mxu1 %v2436_v5 }
 0x65a   : > { %v2332_v4 = vpop.eup %2331 }
 0x65b   : > { %v1423_v7 = vmul.f32 %v2332_v4, %v2324_v47 }
 0x65d   : > { %2160 = vmatmul.mubr.msk.bf16.vlgmr.msra.gmra.mxu1 %vm1019_vm4, %v1308_v3  ;;  %v1424_v8 = vpack.c.bf16 %v1423_v7, %v1423_v7 }
 0x65e   : > { %2170 = vmatpush3.bf16.msra.mxu1 %v1431_v6  ;;  %2171 = vmatprep.mubr.msk.bf16.mxu1 %vm2437_vm2, %v2436_v5 }
 0x65f   : > { %2183 = vmatprep.subr.bf16.mxu1 %v2436_v5 }
 0x665   : > { %2172 = vmatmul.mubr.msk.bf16.vlgmr.msra.gmra.mxu1 %vm1019_vm4, %v1424_v8 }
 0x666   : > { %2187 = vmatprep.mubr.msk.bf16.mxu1 %vm2437_vm2, %v2436_v5  ;;  %2184 = vmatpush3.bf16.msra.mxu1 %v2307_v40 }
 0x667   : > { %2185 = vmatprep.subr.bf16.mxu1 %v2436_v5 }
 0x66a   : > { %2186 = vmatpush3.bf16.msra.mxu1 %v2308_v41 }
 0x70d   : > { %v1123_v9 = vpop.f32.mrf.mxu1 }
 0x70e   : > { %1129 = vst.msk [vmem:[#allocation3] sm:$0x1] %vm1066_vm5, %v1123_v9 }
 0x70f   : > { %v2137_v10 = vpop.f32.mrf.mxu1 }
 0x711   : > { %v1126_v11 = vpop.f32.mrf.mxu1 }
 0x713   : > { %v2138_v12 = vpop.f32.mrf.mxu1 }
 0x715   : > { %v1235_v13 = vpop.f32.mrf.mxu1 }
 0x716   : > { %1242 = vrot.lane.b32.xlu0 %v1235_v13, %s2445_s23 }
 0x717   : > { %v2149_v14 = vpop.f32.mrf.mxu1 }
 0x719   : > { %v1238_v15 = vpop.f32.mrf.mxu1 }
 0x71b   : > { %v2150_v17 = vpop.f32.mrf.mxu1 }
 0x71d   : > { %v1351_v19 = vpop.f32.mrf.mxu1 }
 0x71e   : > { %1358 = vrot.lane.b32.xlu1 %v1351_v19, %s2446_s14 }
 0x71f   : > { %v2161_v20 = vpop.f32.mrf.mxu1 }
 0x721   : > { %v1354_v21 = vpop.f32.mrf.mxu1 }
 0x723   : > { %v2162_v22 = vpop.f32.mrf.mxu1 }
 0x725   : > { %v1467_v23 = vpop.f32.mrf.mxu1 }
 0x726   : > { %1474 = vrot.lane.b32.xlu0 %v1467_v23, %s2447_s5 }
 0x727   : > { %v2173_v24 = vpop.f32.mrf.mxu1 }
 0x729   : > { %v1470_v26 = vpop.f32.mrf.mxu1 }
 0x72b   : > { %v2174_v27 = vpop.f32.mrf.mxu1 }
 0x788   : > { %v1243_v28 = vpop.permute.xlu0 %1242 }
 0x789   : > { %1246 = vst.msk [vmem:[#allocation3] sm:$0x1] %vm1245_vm7, %v1243_v28 }
 0x790   : > { %v1359_v29 = vpop.permute.xlu1 %1358 }
 0x791   : > { %1362 = vst.msk [vmem:[#allocation3] sm:$0x1] %vm1361_vm8, %v1359_v29 }
 0x798   : > { %v1475_v30 = vpop.permute.xlu0 %1474 }
 0x799   : > { %1478 = vst.msk [vmem:[#allocation3] sm:$0x1] %vm1477_vm9, %v1475_v30 }
 0x7a0   : > { %v1479_v31 = vld [vmem:[#allocation3] sm:$0x1] }
 0x7a1   : > { %v1480_v32 = vpack.c.bf16 %v1479_v31, %v1479_v31 }
 0x7a3   : > { %2180 = vmatmul.mubr.msk.bf16.vlgmr.msra.gmra.mxu0 %vm782_vm3, %v1480_v32 }
 0x7a4   : > { %2199 = vmatprep.mubr.msk.bf16.mxu0 %vm2437_vm2, %v2436_v5  ;;  %2192 = vmatpush3.bf16.msra.mxu0 %v2309_v50 }
 0x7a5   : > { %2193 = vmatprep.subr.bf16.mxu0 %v2436_v5 }
 0x7a8   : > { %2194 = vmatpush3.bf16.msra.mxu0 %v2310_v51 }
 0x7a9   : > { %2195 = vmatprep.subr.bf16.mxu0 %v2436_v5 }
 0x7ac   : > { %2196 = vmatpush3.bf16.msra.mxu0 %v2311_v52 }
 0x7ad   : > { %2197 = vmatprep.subr.bf16.mxu0 %v2436_v5 }
 0x7b0   : > { %2198 = vmatpush3.bf16.msra.mxu0 %v2312_v53 }
 0x863   : > { %v1534_v33 = vpop.f32.mrf.mxu0 }
 0x864   : > { %v1540_v34 = vadd.f32 %v1534_v33, %v2706_v25 }
 0x865   : > { %v2181_v35 = vpop.f32.mrf.mxu0 }
 0x866   : > { %v1542_v36 = vmul.f32 %v1540_v34, %v1540_v34 }
 0x867   : > { %v1537_v37 = vpop.f32.mrf.mxu0 }
 0x868   : > { %v1543_v38 = vsel %vm751_vm1, %v1542_v36, 0.0 }
 0x869   : > { %1544 = vadd.xlane.f32.xlu1 %v1543_v38  ;;  %v2182_v39 = vpop.f32.mrf.mxu0 }
 0x8f2   : > { %v1545_v42 = vpop.xlane.xlu1 %1544 }
 0x8f3   : > { %v1546_v43 = vmul.f32 0.03125, %v1545_v42 }
 0x8f5   : > { %v1547_v25 = vadd.f32 1e-06, %v1546_v43 }
 0x8f7   : > { %2333 = vrsqrt.f32 %v1547_v25 }
 0x904   : > { %v2334_v44 = vpop.eup %2333 }
 0x905   : > { %v1549_v47 = vmul.f32 %v2334_v44, %v1540_v34 }
 0x907   : > { %v1550_v48 = vmul.f32 %v1549_v47, %v1541_v45 }
 0x909   : > { %v1551_v49 = vpack.c.bf16 %v1550_v48, %v1550_v48 }
 0x90b   : > { %2188 = vmatmul.mubr.msk.bf16.vlgmr.msra.gmra.mxu1 %vm782_vm3, %v1551_v49 }
 0x9cb   : > { %v1605_v54 = vpop.f32.mrf.mxu1 }
 0x9cc   : > { %1621 = vrot.lane.b32.xlu0 %v1605_v54, %s2435_s1  ;;  %v1612_v58 = vmul.f32 0.044715, %v1605_v54  ;;  %v1611_v0 = vmul.f32 0.5, %v1605_v54 }
 0x9cd   : > { %v2189_v55 = vpop.f32.mrf.mxu1 }
 0x9ce   : > { %v1613_v59 = vmul.f32 %v1612_v58, %v1605_v54 }
 0x9cf   : > { %v1608_v56 = vpop.f32.mrf.mxu1 }
 0x9d0   : > { %v1614_v46 = vmul.f32 %v1613_v59, %v1605_v54 }
 0x9d1   : > { %v2190_v57 = vpop.f32.mrf.mxu1 }
 0x9d2   : > { %v1615_v60 = vadd.f32 %v1614_v46, %v1605_v54 }
 0x9d4   : > { %v1616_v61 = vmul.f32 0.7978846, %v1615_v60 }
 0x9d6   : > { %2335 = vtanh.f32 %v1616_v61 }
 0x9e3   : > { %v2336_v62 = vpop.eup %2335 }
 0x9e4   : > { %v1618_v63 = vadd.f32 1.0, %v2336_v62 }
 0x9e6   : > { %v1619_v1 = vmul.f32 %v1618_v63, %v1611_v0 }
 0xa3e   : > { %v1622_v2 = vpop.permute.xlu0 %1621 }
 0xa3f   : > { %v1624_v5 = vmul.f32 %v1622_v2, %v1619_v1 }
 0xa41   : > { %v1625_v3 = vpack.c.bf16 %v1624_v5, %v1624_v5 }
 0xa43   : > { %2200 = vmatmul.mubr.msk.bf16.vlgmr.msra.gmra.mxu0 %vm1658_vm10, %v1625_v3 }
 0xb03   : > { %v1696_v4 = vpop.f32.mrf.mxu0 }
 0xb04   : > { %v1702_v6 = vadd.f32 %v1696_v4, %v1540_v34 }
 0xb05   : > { %v2201_v7 = vpop.f32.mrf.mxu0  ;;  %1707 = sbr.rel (%p2039_p1) target bundleno = 3190 (0xc76), region = 92 }
 0xb06   : > { %1703 = vst.msk [vmem:[#allocation2] sm:$0x1] %vm751_vm1, %v1702_v6 }
 0xb07   : > { %v1699_v8 = vpop.f32.mrf.mxu0 }
 0xb09   : > { %v2202_v9 = vpop.f32.mrf.mxu0 }
 0xb0a   : > { %v1709_v10 = vmul.f32 %v1702_v6, %v1702_v6  ;;  %v2337_v12 = vld [vmem:[%s2956_s30 + $0x8] sm:$0xff]   ;;  %v2448_v13 = vmov 0.0   ;;  %v2338_v14 = vld [vmem:[%s2956_s30] sm:$0xff]   ;;  %vm2449_vm11 = vmmov 0  }
 0xb0b   : > { %2203 = vmatprep.subr.bf16.mxu0 %v2448_v13  ;;  %2207 = vmatprep.mubr.msk.bf16.mxu0 %vm2449_vm11, %v2448_v13  ;;  %v1708_v19 = vld [vmem:[%s2957_s16] sm:$0x1] }
 0xb0c   : > { %v1710_v11 = vsel %vm751_vm1, %v1709_v10, 0.0  ;;  %2204 = vmatpush3.bf16.msra.mxu0 %v2337_v12 }
 0xb0d   : > { %1711 = vadd.xlane.f32.xlu0 %v1710_v11  ;;  %2205 = vmatprep.subr.bf16.mxu0 %v2448_v13 }
 0xb10   : > { %2206 = vmatpush3.bf16.msra.mxu0 %v2338_v14 }
 0xb96   : > { %v1712_v15 = vpop.xlane.xlu0 %1711 }
 0xb97   : > { %v1713_v16 = vmul.f32 0.03125, %v1712_v15 }
 0xb99   : > { %v1714_v17 = vadd.f32 1e-06, %v1713_v16 }
 0xb9b   : > { %2339 = vrsqrt.f32 %v1714_v17 }
 0xba8   : > { %v2340_v18 = vpop.eup %2339 }
 0xba9   : > { %v1716_v20 = vmul.f32 %v2340_v18, %v1702_v6 }
 0xbab   : > { %v1717_v21 = vmul.f32 %v1716_v20, %v1708_v19 }
 0xbad   : > { %v1718_v22 = vpack.c.bf16 %v1717_v21, %v1717_v21 }
 0xbaf   : > { %2208 = vmatmul.mubr.msk.bf16.vlgmr.msra.gmra.mxu0 %vm782_vm3, %v1718_v22 }
 0xc6f   : > { %v1772_v23 = vpop.f32.mrf.mxu0 }
 0xc70   : > { %1778 = vst [vmem:[%s2677_s3] sm:$0x1] %v1772_v23 }
 0xc71   : > { %v2209_v24 = vpop.f32.mrf.mxu0 }
 0xc73   : > { %v1775_v26 = vpop.f32.mrf.mxu0 }
 0xc75   : > { %v2210_v27 = vpop.f32.mrf.mxu0 }
 0xc76 PF: > { %s2958_s25 = sld [smem:[#allocation10_spill]]  ;;  %s1792_s29 = sshll.u32 %s2677_s3, 4  ;;  %s1793_s29 = int_to_ptr.vmem [resolvable:$true] %s1792_s29 }
 0xc77   : > { %s2960_s28 = sld [smem:[#allocation30_spill]]  ;;  %s2961_s22 = sand.u32 1, %s2409_s2  }
 0xc78   : > { %s1780_s27 = scalar_lea.sflag [#allocation5], %s2961_s22  ;;  %s2341_s26 = scalar_lea.vmem %s1793_s29, 16 }
 0xc79   : > { %p2342_p2 = scmp.ne.s32.totalorder %s1793_s29, %s2341_s26  ;;  %s2450_s23 = smov [#allocation4]  }
 0xc7a   : > { %s2345_s14 = sshll.u32 %s2450_s23, 4  ;;  %s2346_s14 = int_to_ptr.vmem [resolvable:$false] %s2345_s14 }
 0xc7b   : > { %p2343_p4 = pnand %p2342_p2, %p2585_p3  ;;  %s2347_s5 = scalar_lea.vmem %s2346_s14, 32 }
 0xc7c   : > { %s2043_s0 = sshll.u32 %s2958_s25, 4  ;;  %p2348_p6 = scmp.lt.s32.totalorder %s1793_s29, %s2346_s14 }
 0xc7d   : > { %s1790_s15 = scalar_lea.hbm %s2960_s28, %s2043_s0  ;;  %p2344_p5 = pneg %p2343_p4 }
 0xc7e   : > { %p2349_p7 = scmp.lt.s32.totalorder %s2347_s5, %s2341_s26 }
 0xc80   : > { %p2350_p8 = por %p2349_p7, %p2348_p6 }
 0xc82   : > { %p2351_p10 = pnand %p2350_p8, %p2344_p5 }
 0xc84   : > { %2354 = shalt.err (!%p2351_p10)
}
 0xc85   : > { %s2355_s13 = scalar_lea.hbm %s1790_s15, 16  ;;  %s2359_s24 = scalar_lea.hbm %s2960_s28, 32 }
 0xc86   : > { %p2356_p11 = scmp.ne.s32.totalorder %s1790_s15, %s2355_s13  ;;  %p2360_p0 = scmp.lt.s32.totalorder %s1790_s15, %s2960_s28 }
 0xc87   : > { %p2361_p1 = scmp.lt.s32.totalorder %s2359_s24, %s2355_s13 }
 0xc88   : > { %p2357_p12 = pnand %p2356_p11, %p2585_p3 }
 0xc89   : > { %p2362_p2 = por %p2361_p1, %p2360_p0 }
 0xc8a   : > { %p2358_p13 = pneg %p2357_p12 }
 0xc8c   : > { %p2363_p4 = pnand %p2362_p2, %p2358_p13 }
 0xc8e   : > { %2366 = shalt.err (!%p2363_p4)
}
 0xc8f   : > { %2211 = dma.vmem_to_hbm [thread:$0]  (%p2585_p3), %s1793_s29, 16, %s1790_s15, %s1780_s27  }
 0xc90 PF: > { %s2962_s1 = sld [smem:[#allocation13_spill]] }
 0xc91   : > { %s2963_s8 = sld [smem:[#allocation7_spill]] }
 0xc96   : > { %p2217_p5 = scmp.ge.s32.totalorder %s2962_s1, 2 }
 0xc97   : > { %s1804_s12 = sand.u32 1, %s2963_s8  }
 0xc98   : > { %p2214_p6 = pnand %p2217_p5, %p2595_p9  ;;  %s1805_s16 = scalar_lea.sflag [#allocation5], %s1804_s12 }
 0xc9a   : > { %p2215_p7 = pneg %p2214_p6 }
 0xc9c   : > { %2400 = dma.done.wait (%p2215_p7), %s1805_s16, 16  }
 0xc9d   : > { %2402 = vsyncadd (%p2215_p7), %s1805_s16, 4294967280  ;;  %s29_s26 = sadd.s32 1, %s2962_s1   ;;  %s2965_s25 = sld [smem:[#allocation8_spill]] }
 0xc9e   : > { %p26_p8 = scmp.ge.s32.totalorder %s29_s26, 6   ;;  %s2966_s21 = sld [smem:[#allocation18_spill]] }
 0xc9f   : > { %s2967_s22 = sld [smem:[#allocation11_spill]]  ;;  %s2971_s20 = smov %s2409_s2 }
 0xca0   : > { %s2968_s23 = sld [smem:[#allocation12_spill]] }
 0xca1   : > { %s2969_s24 = sld [smem:[#allocation14_spill]] }
 0xca2   : > { %s2970_s17 = sld [smem:[#allocation16_spill]] }
 0xca3   : > { %s2972_s2 = smov %s2965_s25 }
 0xca4   :  { %28 = sbr.rel (!%p26_p8) target bundleno = 18 (0x12), region = 163 }
 0xca8   : > { %s2973_s25 = smov %s2970_s17 }
 0xca9   :  { %1809 = vsyncpa [#allocation5], 1 }
 0xcaa   :  { %1811 = vsyncpa [#allocation5 + $0x1], 1 }

</bundles_post_ra>
